<compile_context>
chip_gen: v7x
topology: tpu7x:2x2x1
jax: 0.10.0
libtpu: 0.0.40
codegen_flags: <defaults>
</compile_context>

<pallas_src>
import functools

import jax
import jax.numpy as jnp
from jax import lax
from jax.experimental import pallas as pl
from jax.experimental.pallas import tpu as pltpu


def _round_up(a: int, b: int) -> int:
    return (a + b - 1) // b * b


def _cdiv(a: int, b: int) -> int:
    return (a + b - 1) // b


def _vmem_capacity_bytes() -> int:
    """Physical VMEM per TensorCore; conservative v7x fallback (64 MiB)."""
    try:
        return int(pltpu.get_tpu_info().vmem_capacity_bytes)
    except Exception:
        return 64 * 1024 * 1024


def _pick_row_tile(n_rows: int, tm_req: int) -> int:
    """Row tile: <= tm_req, multiple of 16 (bf16 sublanes), balanced so the
    last tile is not mostly padding, 128/256-aligned for the MXU."""
    n16 = _round_up(n_rows, 16)
    if n16 <= tm_req:
        # Single row tile.  NOTE (v7x): with 2 TensorCores one core idles in
        # this case; for large-but-single-tile N prefer growing tn instead.
        return n16
    n_tiles = _cdiv(n_rows, tm_req)
    tm = _cdiv(n_rows, n_tiles)
    align = 256 if tm >= 256 else (128 if tm >= 128 else 16)
    return min(_round_up(tm, align), tm_req)


def _pred_layer_kernel(x_ref, w_ref, b_ref, y_ref,
                       scores_ref, rloss_ref,
                       m_sc, l_sc, lab_sc):
    # x_ref: (tm, D) bf16      w_ref: (D, tn) bf16 (pre-transposed weight)
    # b_ref: (1, tn) f32       y_ref: (tm, 1) int32
    # scores_ref: (tm, tn)     rloss_ref: (tm, 1) f32
    #
    # The vocab axis (j) MUST stay the innermost ('arbitrary') grid axis: the
    # scratch accumulators are re-initialized at j==0 for every row tile.
    j = pl.program_id(1)

    @pl.when(j == 0)
    def _():
        m_sc[...] = jnp.full_like(m_sc, -jnp.inf)
        l_sc[...] = jnp.zeros_like(l_sc)
        lab_sc[...] = jnp.zeros_like(lab_sc)

    # Canonical (M, K) x (K, N) MXU matmul, f32 accumulation.
    s = jnp.dot(x_ref[...], w_ref[...], preferred_element_type=jnp.float32)
    s = s + b_ref[...]

    scores_ref[...] = s.astype(scores_ref.dtype)

    # Online log-sum-exp over vocab tiles.
    m_prev = m_sc[...]
    m_new = jnp.maximum(m_prev, jnp.max(s, axis=-1, keepdims=True))
    alpha = jnp.exp(m_prev - m_new)
    l_sc[...] = alpha * l_sc[...] + jnp.sum(jnp.exp(s - m_new), axis=-1,
                                            keepdims=True)
    m_sc[...] = m_new

    # Label score for labels falling in this vocab tile: compare the lane
    # iota against (label - tile_start) so the per-tile offset stays a
    # (tm, 1) operand instead of a full-tile i32 add.
    tn = s.shape[1]
    col = lax.broadcasted_iota(jnp.int32, s.shape, 1)
    hit = col == (y_ref[...] - j * tn)
    lab_sc[...] += jnp.sum(jnp.where(hit, s, 0.0), axis=-1, keepdims=True)

    @pl.when(j == pl.num_programs(1) - 1)
    def _():
        rloss_ref[...] = m_sc[...] + jnp.log(l_sc[...]) - lab_sc[...]


def prepare_pred_layer_params(weight, bias, *, tn: int = 2048):
    """One-time parameter prep (do this at init, NOT per step).

    Casts the projection weight to bf16, pre-transposes it to (D, V) so the
    kernel's contraction is the canonical MXU form, and pads the vocab axis
    to a multiple of the vocab tile (padded columns get a -1e30 bias so they
    vanish from the softmax).  Returns (wt_bf16 (D, v_pad), bias_f32 (1, v_pad)).
    """
    V, D = weight.shape
    tn_eff = min(tn, _round_up(V, 128))
    v_pad = _round_up(V, tn_eff)
    wt = weight.T.astype(jnp.bfloat16)              # (D, V), one-time cost
    bf = bias.astype(jnp.float32)
    if v_pad != V:
        wt = jnp.pad(wt, ((0, 0), (0, v_pad - V)))
        bf = jnp.pad(bf, (0, v_pad - V), constant_values=-1e30)
    return wt, bf.reshape(1, v_pad)


@functools.partial(jax.jit,
                   static_argnames=("n_words", "tm", "tn", "scores_dtype"))
def pred_layer_forward(x, y, wt, b2d, *, n_words, tm=1024, tn=2048,
                       scores_dtype=jnp.bfloat16):
    """Mimics PredLayer.forward: returns (scores, loss).

    `wt` is the pre-transposed bf16 weight (D, V or padded V), `b2d` the f32
    bias (1, same) — use prepare_pred_layer_params once at init.  The PyTorch
    `(y == pad_index).sum() == 0` assert is hoisted out of this jitted path.
    """
    D, v_stored = wt.shape
    V = n_words
    if b2d.ndim == 1:
        b2d = b2d.reshape(1, -1)

    x2d = x.reshape(-1, D).astype(jnp.bfloat16)
    N = x2d.shape[0]
    y2d = y.reshape(-1, 1).astype(jnp.int32)

    # ---- static tile selection (all Python ints, resolved at trace time) ----
    cap = _vmem_capacity_bytes()
    tm_eff = _pick_row_tile(N, tm)
    tn_eff = min(tn, _round_up(v_stored, 128))
    s_bytes = jnp.dtype(scores_dtype).itemsize

    def footprint(tm_, tn_):
        # double-buffered inputs + outputs (BlockSpec pipeline) + scratch
        ins = 2 * (tm_ * D * 2 + D * tn_ * 2 + tn_ * 4 + tm_ * 4)
        outs = 2 * (tm_ * tn_ * s_bytes + tm_ * 4)
        scratch = 3 * tm_ * 4
        return ins + outs + scratch

    budget = int(cap * 0.7)          # leave compiler-internal scratch headroom
    while footprint(tm_eff, tn_eff) > budget:
        if tn_eff > 512:
            tn_eff = max(512, _round_up(tn_eff // 2, 128))
        elif tm_eff > 128:
            tm_eff = max(128, _round_up(tm_eff // 2, 128))
        else:
            break

    n_pad = _round_up(N, tm_eff)
    v_pad = _round_up(v_stored, tn_eff)

    # These pads are no-ops (emit nothing) when the caller pre-prepped the
    # params with a matching tile and N divides the row tile.
    if n_pad != N:
        x2d = jnp.pad(x2d, ((0, n_pad - N), (0, 0)))
        y2d = jnp.pad(y2d, ((0, n_pad - N), (0, 0)))
    if v_pad != v_stored:
        wt = jnp.pad(wt, ((0, 0), (0, v_pad - v_stored)))
        b2d = jnp.pad(b2d, ((0, 0), (0, v_pad - v_stored)),
                      constant_values=-1e30)

    grid = (n_pad // tm_eff, v_pad // tn_eff)
    vmem_limit = max(16 << 20,
                     min(int(cap * 0.9), footprint(tm_eff, tn_eff) + (8 << 20)))

    scores, row_loss = pl.pallas_call(
        _pred_layer_kernel,
        out_shape=(
            jax.ShapeDtypeStruct((n_pad, v_pad), scores_dtype),
            jax.ShapeDtypeStruct((n_pad, 1), jnp.float32),
        ),
        grid_spec=pltpu.PrefetchScalarGridSpec(
            num_scalar_prefetch=0,
            grid=grid,
            in_specs=[
                pl.BlockSpec((tm_eff, D), lambda i, j: (i, 0)),   # activations
                pl.BlockSpec((D, tn_eff), lambda i, j: (0, j)),   # weight (D, V)
                pl.BlockSpec((1, tn_eff), lambda i, j: (0, j)),   # bias slice
                pl.BlockSpec((tm_eff, 1), lambda i, j: (i, 0)),   # labels
            ],
            out_specs=(
                pl.BlockSpec((tm_eff, tn_eff), lambda i, j: (i, j)),  # scores
                pl.BlockSpec((tm_eff, 1), lambda i, j: (i, 0)),       # row loss
            ),
            scratch_shapes=[
                pltpu.VMEM((tm_eff, 1), jnp.float32),   # running max
                pltpu.VMEM((tm_eff, 1), jnp.float32),   # running sum(exp)
                pltpu.VMEM((tm_eff, 1), jnp.float32),   # running label score
            ],
        ),
        compiler_params=pltpu.CompilerParams(
            dimension_semantics=("parallel", "arbitrary"),
            vmem_limit_bytes=vmem_limit,
        ),
    )(x2d, wt, b2d, y2d)

    out_scores = scores
    if v_pad != V:
        out_scores = out_scores[:, :V]
    if n_pad != N:
        out_scores = out_scores[:N]
        row_loss = row_loss[:N]
    loss = jnp.sum(row_loss[:, 0]) / N
    return out_scores, loss


if __name__ == "__main__":
    # Small shapes chosen so tm | N and tn | V: no padding and no post-kernel
    # slice, while still exercising a multi-tile (2 x 4) grid and the online
    # log-sum-exp across vocab tiles.
    seq, batch, emb_dim, n_words, pad_index = 16, 16, 128, 1024, 2

    key = jax.random.PRNGKey(0)
    kx, kw, kb, ky = jax.random.split(key, 4)

    x = jax.random.normal(kx, (seq, batch, emb_dim), dtype=jnp.float32)

    # Deterministic nn.Linear-style init: U(-1/sqrt(dim), 1/sqrt(dim)).
    bound = 1.0 / (emb_dim ** 0.5)
    weight = jax.random.uniform(kw, (n_words, emb_dim), jnp.float32, -bound, bound)
    bias = jax.random.uniform(kb, (n_words,), jnp.float32, -bound, bound)

    n = seq * batch
    y_raw = jax.random.randint(ky, (n,), 0, n_words - 1, dtype=jnp.int32)
    y = jnp.where(y_raw >= pad_index, y_raw + 1, y_raw)   # never pad_index

    # PyTorch's pad_index assert, hoisted out of the jitted forward path.
    assert int(jnp.sum(y == pad_index)) == 0

    # One-time parameter prep (cast / transpose / pad hoisted out of forward).
    wt, b2d = prepare_pred_layer_params(weight, bias, tn=256)

    scores, loss = pred_layer_forward(x, y, wt, b2d, n_words=n_words,
                                      tm=128, tn=256)
    jax.block_until_ready((scores, loss))

    # Pure-JAX reference with the same bf16 inputs / f32 accumulation.
    xr = x.reshape(-1, emb_dim).astype(jnp.bfloat16).astype(jnp.float32)
    wr = weight.astype(jnp.bfloat16).astype(jnp.float32)
    ref_scores = xr @ wr.T + bias
    logz = jax.scipy.special.logsumexp(ref_scores, axis=-1)
    ref_loss = jnp.mean(logz - ref_scores[jnp.arange(n), y])

    assert scores.shape == (n, n_words)
    assert jnp.allclose(scores.astype(jnp.float32), ref_scores,
                        atol=3e-2, rtol=3e-2), \
        float(jnp.max(jnp.abs(scores.astype(jnp.float32) - ref_scores)))
    assert jnp.allclose(loss, ref_loss, atol=2e-3, rtol=2e-3), \
        (float(loss), float(ref_loss))

    print("KERNEL_OK")
</pallas_src>

<mosaic_0001>
module attributes {stable_mosaic.version = 11 : i64} {
  func.func @_pred_layer_kernel(%arg0: i32, %arg1: i32, %arg2: memref<128x128xbf16, #tpu.memory_space<vmem>>, %arg3: memref<128x256xbf16, #tpu.memory_space<vmem>>, %arg4: memref<1x256xf32, #tpu.memory_space<vmem>>, %arg5: memref<128x1xi32, #tpu.memory_space<vmem>>, %arg6: memref<128x256xbf16, #tpu.memory_space<vmem>>, %arg7: memref<128x1xf32, #tpu.memory_space<vmem>>, %arg8: memref<128x1xf32, #tpu.memory_space<vmem>>, %arg9: memref<128x1xf32, #tpu.memory_space<vmem>>, %arg10: memref<128x1xf32, #tpu.memory_space<vmem>>) attributes {dimension_semantics = [#tpu.dimension_semantics<parallel>, #tpu.dimension_semantics<arbitrary>], iteration_bounds = array<i64: 2, 4>, scalar_prefetch = 0 : i64, scratch_operands = 3 : i64, tpu.core_type = #tpu.core_type<tc>, window_params = [{transform_indices = @transform_0, window_bounds = array<i64: 128, 128>}, {transform_indices = @transform_1, window_bounds = array<i64: 128, 256>}, {transform_indices = @transform_2, window_bounds = array<i64: 1, 256>}, {transform_indices = @transform_3, window_bounds = array<i64: 128, 1>}, {transform_indices = @transform_4, window_bounds = array<i64: 128, 256>}, {transform_indices = @transform_5, window_bounds = array<i64: 128, 1>}]} {
    %c0_i32 = arith.constant 0 : i32
    %0 = arith.cmpi eq, %arg1, %c0_i32 : i32
    %1 = arith.extui %0 : i1 to i32
    %c0_i32_0 = arith.constant 0 : i32
    %2 = arith.cmpi ne, %1, %c0_i32_0 : i32
    scf.if %2 {
      %cst_27 = arith.constant 0xFF800000 : f32
      %44 = vector.broadcast %cst_27 : f32 to vector<128x1xf32>
      %c0_28 = arith.constant 0 : index
      %c0_29 = arith.constant 0 : index
      %45 = vector.load %arg8[%c0_28, %c0_29] : memref<128x1xf32, #tpu.memory_space<vmem>>, vector<128x1xf32>
      tpu.vector_store %arg8[%c0_28, %c0_29], %44 {strides = array<i32>} : memref<128x1xf32, #tpu.memory_space<vmem>>, vector<128x1xf32>,
      %cst_30 = arith.constant 0.000000e+00 : f32
      %46 = vector.broadcast %cst_30 : f32 to vector<128x1xf32>
      %c0_31 = arith.constant 0 : index
      %c0_32 = arith.constant 0 : index
      %47 = vector.load %arg9[%c0_31, %c0_32] : memref<128x1xf32, #tpu.memory_space<vmem>>, vector<128x1xf32>
      tpu.vector_store %arg9[%c0_31, %c0_32], %46 {strides = array<i32>} : memref<128x1xf32, #tpu.memory_space<vmem>>, vector<128x1xf32>,
      %cst_33 = arith.constant 0.000000e+00 : f32
      %48 = vector.broadcast %cst_33 : f32 to vector<128x1xf32>
      %c0_34 = arith.constant 0 : index
      %c0_35 = arith.constant 0 : index
      %49 = vector.load %arg10[%c0_34, %c0_35] : memref<128x1xf32, #tpu.memory_space<vmem>>, vector<128x1xf32>
      tpu.vector_store %arg10[%c0_34, %c0_35], %48 {strides = array<i32>} : memref<128x1xf32, #tpu.memory_space<vmem>>, vector<128x1xf32>,
    } else {
    }
    %c0 = arith.constant 0 : index
    %c0_1 = arith.constant 0 : index
    %3 = vector.load %arg2[%c0, %c0_1] : memref<128x128xbf16, #tpu.memory_space<vmem>>, vector<128x128xbf16>
    %c0_2 = arith.constant 0 : index
    %c0_3 = arith.constant 0 : index
    %4 = vector.load %arg3[%c0_2, %c0_3] : memref<128x256xbf16, #tpu.memory_space<vmem>>, vector<128x256xbf16>
    %cst = arith.constant dense<0.000000e+00> : vector<128x256xf32>
    %5 = tpu.matmul %3, %4, %cst {dimension_numbers = #tpu.dot_dimension_numbers<[1], [0], [0], [1], [0, 0, 1, 1], [], []>} : vector<128x128xbf16>, vector<128x256xbf16>, vector<128x256xf32> -> vector<128x256xf32>
    %c0_4 = arith.constant 0 : index
    %c0_5 = arith.constant 0 : index
    %6 = vector.load %arg4[%c0_4, %c0_5] : memref<1x256xf32, #tpu.memory_space<vmem>>, vector<1x256xf32>
    %7 = vector.broadcast %6 : vector<1x256xf32> to vector<128x256xf32>
    %8 = arith.addf %5, %7 : vector<128x256xf32>
    %9 = arith.truncf %8 : vector<128x256xf32> to vector<128x256xbf16>
    %c0_6 = arith.constant 0 : index
    %c0_7 = arith.constant 0 : index
    %10 = vector.load %arg6[%c0_6, %c0_7] : memref<128x256xbf16, #tpu.memory_space<vmem>>, vector<128x256xbf16>
    tpu.vector_store %arg6[%c0_6, %c0_7], %9 {strides = array<i32>} : memref<128x256xbf16, #tpu.memory_space<vmem>>, vector<128x256xbf16>,
    %c0_8 = arith.constant 0 : index
    %c0_9 = arith.constant 0 : index
    %11 = vector.load %arg8[%c0_8, %c0_9] : memref<128x1xf32, #tpu.memory_space<vmem>>, vector<128x1xf32>
    %cst_10 = arith.constant dense<0xFF800000> : vector<128xf32>
    %12 = vector.multi_reduction <maximumf>, %8, %cst_10 [1] : vector<128x256xf32> to vector<128xf32>
    %13 = vector.shape_cast %12 : vector<128xf32> to vector<128x1xf32>
    %14 = arith.maximumf %11, %13 : vector<128x1xf32>
    %15 = arith.subf %11, %14 : vector<128x1xf32>
    %16 = math.exp %15 : vector<128x1xf32>
    %c0_11 = arith.constant 0 : index
    %c0_12 = arith.constant 0 : index
    %17 = vector.load %arg9[%c0_11, %c0_12] : memref<128x1xf32, #tpu.memory_space<vmem>>, vector<128x1xf32>
    %18 = arith.mulf %16, %17 : vector<128x1xf32>
    %19 = vector.broadcast %14 : vector<128x1xf32> to vector<128x256xf32>
    %20 = arith.subf %8, %19 : vector<128x256xf32>
    %21 = math.exp %20 : vector<128x256xf32>
    %cst_13 = arith.constant dense<0.000000e+00> : vector<128xf32>
    %22 = vector.multi_reduction <add>, %21, %cst_13 [1] : vector<128x256xf32> to vector<128xf32>
    %23 = vector.shape_cast %22 : vector<128xf32> to vector<128x1xf32>
    %24 = arith.addf %18, %23 : vector<128x1xf32>
    %c0_14 = arith.constant 0 : index
    %c0_15 = arith.constant 0 : index
    %25 = vector.load %arg9[%c0_14, %c0_15] : memref<128x1xf32, #tpu.memory_space<vmem>>, vector<128x1xf32>
    tpu.vector_store %arg9[%c0_14, %c0_15], %24 {strides = array<i32>} : memref<128x1xf32, #tpu.memory_space<vmem>>, vector<128x1xf32>,
    %c0_16 = arith.constant 0 : index
    %c0_17 = arith.constant 0 : index
    %26 = vector.load %arg8[%c0_16, %c0_17] : memref<128x1xf32, #tpu.memory_space<vmem>>, vector<128x1xf32>
    tpu.vector_store %arg8[%c0_16, %c0_17], %14 {strides = array<i32>} : memref<128x1xf32, #tpu.memory_space<vmem>>, vector<128x1xf32>,
    %27 = tpu.iota {dimensions = array<i32: 1>} : vector<128x256xi32>
    %c0_18 = arith.constant 0 : index
    %c0_19 = arith.constant 0 : index
    %28 = vector.load %arg5[%c0_18, %c0_19] : memref<128x1xi32, #tpu.memory_space<vmem>>, vector<128x1xi32>
    %c256_i32 = arith.constant 256 : i32
    %29 = arith.muli %arg1, %c256_i32 : i32
    %30 = vector.broadcast %29 : i32 to vector<128x1xi32>
    %31 = arith.subi %28, %30 : vector<128x1xi32>
    %32 = vector.broadcast %31 : vector<128x1xi32> to vector<128x256xi32>
    %33 = arith.cmpi eq, %27, %32 : vector<128x256xi32>
    %c0_20 = arith.constant 0 : index
    %c0_21 = arith.constant 0 : index
    %34 = vector.load %arg10[%c0_20, %c0_21] : memref<128x1xf32, #tpu.memory_space<vmem>>, vector<128x1xf32>
    %cst_22 = arith.constant 0.000000e+00 : f32
    %35 = vector.broadcast %cst_22 : f32 to vector<128x256xf32>
    %36 = arith.select %33, %8, %35 : vector<128x256xi1>, vector<128x256xf32>
    %cst_23 = arith.constant dense<0.000000e+00> : vector<128xf32>
    %37 = vector.multi_reduction <add>, %36, %cst_23 [1] : vector<128x256xf32> to vector<128xf32>
    %38 = vector.shape_cast %37 : vector<128xf32> to vector<128x1xf32>
    %39 = arith.addf %34, %38 : vector<128x1xf32>
    %c0_24 = arith.constant 0 : index
    %c0_25 = arith.constant 0 : index
    %40 = vector.load %arg10[%c0_24, %c0_25] : memref<128x1xf32, #tpu.memory_space<vmem>>, vector<128x1xf32>
    tpu.vector_store %arg10[%c0_24, %c0_25], %39 {strides = array<i32>} : memref<128x1xf32, #tpu.memory_space<vmem>>, vector<128x1xf32>,
    %c3_i32 = arith.constant 3 : i32
    %41 = arith.cmpi eq, %arg1, %c3_i32 : i32
    %42 = arith.extui %41 : i1 to i32
    %c0_i32_26 = arith.constant 0 : i32
    %43 = arith.cmpi ne, %42, %c0_i32_26 : i32
    scf.if %43 {
      %c0_27 = arith.constant 0 : index
      %c0_28 = arith.constant 0 : index
      %44 = vector.load %arg8[%c0_27, %c0_28] : memref<128x1xf32, #tpu.memory_space<vmem>>, vector<128x1xf32>
      %c0_29 = arith.constant 0 : index
      %c0_30 = arith.constant 0 : index
      %45 = vector.load %arg9[%c0_29, %c0_30] : memref<128x1xf32, #tpu.memory_space<vmem>>, vector<128x1xf32>
      %46 = math.log %45 : vector<128x1xf32>
      %47 = arith.addf %44, %46 : vector<128x1xf32>
      %c0_31 = arith.constant 0 : index
      %c0_32 = arith.constant 0 : index
      %48 = vector.load %arg10[%c0_31, %c0_32] : memref<128x1xf32, #tpu.memory_space<vmem>>, vector<128x1xf32>
      %49 = arith.subf %47, %48 : vector<128x1xf32>
      %c0_33 = arith.constant 0 : index
      %c0_34 = arith.constant 0 : index
      %50 = vector.load %arg7[%c0_33, %c0_34] : memref<128x1xf32, #tpu.memory_space<vmem>>, vector<128x1xf32>
      tpu.vector_store %arg7[%c0_33, %c0_34], %49 {strides = array<i32>} : memref<128x1xf32, #tpu.memory_space<vmem>>, vector<128x1xf32>,
    } else {
    }
    return
  }
  func.func @transform_0(%arg0: i32, %arg1: i32) -> (i32, i32) {
    %c0_i32 = arith.constant 0 : i32
    %c0_i32_0 = arith.constant 0 : i32
    return %arg0, %c0_i32 : i32, i32
  }
  func.func @transform_1(%arg0: i32, %arg1: i32) -> (i32, i32) {
    %c0_i32 = arith.constant 0 : i32
    %c0_i32_0 = arith.constant 0 : i32
    return %c0_i32, %arg1 : i32, i32
  }
  func.func @transform_2(%arg0: i32, %arg1: i32) -> (i32, i32) {
    %c0_i32 = arith.constant 0 : i32
    %c0_i32_0 = arith.constant 0 : i32
    return %c0_i32, %arg1 : i32, i32
  }
  func.func @transform_3(%arg0: i32, %arg1: i32) -> (i32, i32) {
    %c0_i32 = arith.constant 0 : i32
    %c0_i32_0 = arith.constant 0 : i32
    return %arg0, %c0_i32 : i32, i32
  }
  func.func @transform_4(%arg0: i32, %arg1: i32) -> (i32, i32) {
    %c0_i32 = arith.constant 0 : i32
    return %arg0, %arg1 : i32, i32
  }
  func.func @transform_5(%arg0: i32, %arg1: i32) -> (i32, i32) {
    %c0_i32 = arith.constant 0 : i32
    %c0_i32_0 = arith.constant 0 : i32
    return %arg0, %c0_i32 : i32, i32
  }
}

</mosaic_0001>

<bundles_post_ra>
// kernel: pred_layer_forward.1
= control target key start
LH: loop header
LB: loop body
LE: loop exit
PB: predicated region body
PF: predicated region fallthrough
CT: control target
= control target key end

     0   :  { %s3331_s0 = inlined_call_operand.vmem [shape: bf16[256,128], index: 0, kind: input, shape index: {}]   ;;  %s3332_s1 = inlined_call_operand.vmem [shape: bf16[128,1024], index: 1, kind: input, shape index: {}]   ;;  %s3333_s2 = inlined_call_operand.vmem [shape: f32[1,1024], index: 2, kind: input, shape index: {}]   ;;  %s3334_s3 = inlined_call_operand.vmem [shape: s32[256,1], index: 3, kind: input, shape index: {}]   ;;  %s3335_s4 = inlined_call_operand.hbm [shape: bf16[256,1024], index: 4, kind: output, shape index: {0}]   ;;  %s3336_s5 = inlined_call_operand.vmem [shape: f32[256,1], index: 5, kind: output, shape index: {1}]  }
   0x1   :  { %3371 = sst [smem:[#allocation43_spill]] %s3332_s1 }
   0x2   :  { %11 = vsyncpa [#allocation7], 0 }
   0x3   :  { %13 = vsyncpa [#allocation7 + $0x1], 0  ;;  %s2344_s18 = smov 0   ;;  %s2346_s19 = smov 0  }
   0x4   :  { %s2348_s20 = smov 0   ;;  %s2350_s21 = smov 0  }
   0x5   :  { %s2352_s22 = smov 0   ;;  %s2354_s23 = smov 0  }
   0x6   :  { %s2356_s24 = smov 0   ;;  %s2358_s25 = smov 0  }
   0x7   :  { %s2360_s26 = smov 0   ;;  %s2362_s27 = smov 0  }
   0x8 LB: > { %3372 = sst [smem:[#allocation9_spill]] %s2277_s20  ;;  %s1839_s28 = sadd.s32 4294967295, %s2305_s27   ;;  %s2305_s27 = sphi %s2362_s27, %s19_s27   ;;  %s2301_s26 = sphi %s2360_s26, %s3460_s26   ;;  %s2297_s25 = sphi %s2358_s25, %s3459_s25   ;;  %s2293_s24 = sphi %s2356_s24, %s3458_s24   ;;  %s2289_s23 = sphi %s2354_s23, %s3457_s23   ;;  %s2285_s22 = sphi %s2352_s22, %s3456_s22   ;;  %s2281_s21 = sphi %s2350_s21, %s3455_s21   ;;  %s2277_s20 = sphi %s2348_s20, %s3454_s20   ;;  %s2273_s19 = sphi %s2346_s19, %s3462_s19   ;;  %s2269_s18 = sphi %s2344_s18, %s3461_s18  }
   0x9   : > { %3373 = sst [smem:[#allocation10_spill]] %s2285_s22  ;;  %s1840_s29 = sadd.s32 4294967294, %s2305_s27  }
   0xa   : > { %3374 = sst [smem:[#allocation11_spill]] %s2297_s25  ;;  %s28_s30 = sadd.s32 1, %s2297_s25 }
   0xb   : > { %3375 = sst [smem:[#allocation12_spill]] %s2301_s26  ;;  %s31_s6 = sadd.s32 1, %s2301_s26 }
   0xc   : > { %p29_p0 = scmp.ge.s32.totalorder %s28_s30, 4  ;;  %s64_s7 = sadd.s32 1, %s2285_s22 }
   0xd   : > { %p71_p1 = scmp.ne.s32.totalorder %s2285_s22, %s2281_s21  ;;  %p72_p2 = scmp.eq.s32.totalorder %s2305_s27, 0 }
   0xe   : > { %s3464_s30 = smov (%p29_p0, %s28_s30), 0  ;;  %s3466_s6 = smov (!%p29_p0, %s31_s6), %s2301_s26 }
   0xf   : > { %3376 = sst [smem:[#allocation13_spill]] %s3464_s30  ;;  %s61_s8 = ssub.s32 %s2297_s25, %s3464_s30 }
  0x10   : > { %p2407_p3 = por %p72_p2, %p71_p1  ;;  %p33_p4 = scmp.ge.s32.totalorder %s3466_s6, 2 }
  0x11   : > { %p62_p5 = scmp.eq.s32.totalorder %s61_s8, 0  ;;  %s144_s10 = sadd.s32 1, %s2277_s20 }
  0x12   : > { %p154_p6 = scmp.ne.s32.totalorder %s2277_s20, %s2273_s19  ;;  %s3468_s6 = smov (%p33_p4, %s3466_s6), 0 }
  0x13   : > { %3378 = sst [smem:[#allocation14_spill]] %s3468_s6  ;;  %s139_s12 = ssub.s32 %s2301_s26, %s3468_s6 }
  0x14   : > { %s2417_s11 = scalar_select %p62_p5, %s2285_s22, %s64_s7  }
  0x15   : > { %p155_p7 = scmp.eq.s32.totalorder %s1839_s28, 7  ;;  %s141_s13 = sor.u32 %s139_s12, %s61_s8 }
  0x16   : > { %3379 = sst [smem:[#allocation15_spill]] %s2417_s11  ;;  %p160_p8 = scmp.ne.s32.totalorder %s2273_s19, %s2269_s18 }
  0x17   : > { %p142_p9 = scmp.eq.s32.totalorder %s141_s13, 0  ;;  %p2423_p10 = por %p155_p7, %p154_p6 }
  0x18   : > { %p161_p11 = scmp.eq.s32.totalorder %s1840_s29, 7  ;;  %p1842_p13 = scmp.ge.s32.totalorder %s2305_s27, 8 }
  0x19   : > { %s2428_s15 = scalar_select %p142_p9, %s2277_s20, %s144_s10  }
  0x1a   : > { %p2430_p12 = por %p161_p11, %p160_p8  ;;  %203 = sbr.rel (%p1842_p13) target bundleno = 59 (0x3b), region = 16 }
  0x1b   : > { %3381 = sst [smem:[#allocation16_spill]] %s2428_s15 }
  0x1c   : > { %s3382_s16 = scalar_select %p2430_p12, 1, 0 }
  0x1e   : > { %3383 = sst [smem:[#allocation17_spill]] %s3382_s16 }
  0x21   : > { %215 = sbr.rel (!%p2407_p3) target bundleno = 59 (0x3b), region = 24  ;;  %s217_s17 = sand.u32 (%p2407_p3), 1, %s2285_s22  }
  0x22   : > { %s1906_s28 = sshll.u32 (%p2407_p3), %s2297_s25, 3  ;;  %s1843_s7 = sshll.u32 (%p2407_p3), %s217_s17, 7 }
  0x23   : > { %s3384_s1 = sld [smem:[#allocation43_spill]] (%p2407_p3)  ;;  %s219_s9 = scalar_lea.vmem (%p2407_p3), [#allocation5], %s1843_s7 }
  0x29   : > { %s2442_s29 = scalar_lea.vmem %s3384_s1, %s1906_s28 }
  0x2a   : > { %v280_v0 = vld [vmem:[%s2442_s29] sm:$0xff] }
  0x2b   : > { %v282_v1 = vld [vmem:[%s2442_s29 + $0x20] sm:$0xff]  ;;  %281 = vst [vmem:[%s219_s9] sm:$0xff] %v280_v0 }
  0x2c   : > { %v284_v2 = vld [vmem:[%s2442_s29 + $0x40] sm:$0xff]  ;;  %283 = vst [vmem:[%s219_s9 + $0x8] sm:$0xff] %v282_v1 }
  0x2d   : > { %285 = vst [vmem:[%s219_s9 + $0x10] sm:$0xff] %v284_v2  ;;  %v286_v3 = vld [vmem:[%s2442_s29 + $0x60] sm:$0xff] }
  0x2e   : > { %v288_v4 = vld [vmem:[%s2442_s29 + $0x80] sm:$0xff]  ;;  %287 = vst [vmem:[%s219_s9 + $0x18] sm:$0xff] %v286_v3 }
  0x2f   : > { %v290_v5 = vld [vmem:[%s2442_s29 + $0xa0] sm:$0xff]  ;;  %289 = vst [vmem:[%s219_s9 + $0x20] sm:$0xff] %v288_v4 }
  0x30   : > { %291 = vst [vmem:[%s219_s9 + $0x28] sm:$0xff] %v290_v5  ;;  %v292_v6 = vld [vmem:[%s2442_s29 + $0xc0] sm:$0xff] }
  0x31   : > { %v294_v7 = vld [vmem:[%s2442_s29 + $0xe0] sm:$0xff]  ;;  %293 = vst [vmem:[%s219_s9 + $0x30] sm:$0xff] %v292_v6 }
  0x32   : > { %v296_v8 = vld [vmem:[%s2442_s29 + $0x100] sm:$0xff]  ;;  %295 = vst [vmem:[%s219_s9 + $0x38] sm:$0xff] %v294_v7 }
  0x33   : > { %297 = vst [vmem:[%s219_s9 + $0x40] sm:$0xff] %v296_v8  ;;  %v298_v9 = vld [vmem:[%s2442_s29 + $0x120] sm:$0xff] }
  0x34   : > { %v300_v10 = vld [vmem:[%s2442_s29 + $0x140] sm:$0xff]  ;;  %299 = vst [vmem:[%s219_s9 + $0x48] sm:$0xff] %v298_v9 }
  0x35   : > { %v302_v11 = vld [vmem:[%s2442_s29 + $0x160] sm:$0xff]  ;;  %301 = vst [vmem:[%s219_s9 + $0x50] sm:$0xff] %v300_v10 }
  0x36   : > { %303 = vst [vmem:[%s219_s9 + $0x58] sm:$0xff] %v302_v11  ;;  %v304_v12 = vld [vmem:[%s2442_s29 + $0x180] sm:$0xff] }
  0x37   : > { %v306_v13 = vld [vmem:[%s2442_s29 + $0x1a0] sm:$0xff]  ;;  %305 = vst [vmem:[%s219_s9 + $0x60] sm:$0xff] %v304_v12 }
  0x38   : > { %v308_v14 = vld [vmem:[%s2442_s29 + $0x1c0] sm:$0xff]  ;;  %307 = vst [vmem:[%s219_s9 + $0x68] sm:$0xff] %v306_v13 }
  0x39   : > { %309 = vst [vmem:[%s219_s9 + $0x70] sm:$0xff] %v308_v14  ;;  %v310_v15 = vld [vmem:[%s2442_s29 + $0x1e0] sm:$0xff] }
  0x3a   : > { %311 = vst [vmem:[%s219_s9 + $0x78] sm:$0xff] %v310_v15 }
  0x3b PF: > { %p1846_p0 = scmp.ge.s32.totalorder %s2305_s27, 1  ;;  %p333_p1 = scmp.lt.s32.totalorder %s2305_s27, 9 }
  0x3d   : > { %p334_p2 = pnand %p1846_p0, %p333_p1 }
  0x3f   : > { %337 = sbr.rel (%p334_p2) target bundleno = 965 (0x3c5), region = 70 }
  0x46   : > { %s340_s10 = sand.u32 1, %s2281_s21   ;;  %s3338_s13 = sand.u32 1, %s2273_s19  }
  0x47   : > { %s1847_s17 = sshll.u32 %s340_s10, 7  ;;  %s1848_s28 = sshll.u32 %s3338_s13, 7 }
  0x48   : > { %s1849_s7 = sshll.u32 %s2293_s24, 4  ;;  %s2468_s8 = sshll.u32 %s2289_s23, 1 }
  0x49   : > { %p387_p3 = scmp.lt.s32.totalorder %s1849_s7, 31  ;;  %p394_p4 = scmp.lt.s32.totalorder %s2468_s8, 7 }
  0x4a   : > { %s2495_s16 = scalar_lea.vmem [#allocation6], %s1848_s28  ;;  %p1856_p5 = scmp.ne.s32.totalorder %s2289_s23, 0 }
  0x4b   : > { %s3470_s7 = smov (!%p387_p3, %s1849_s7), 31  ;;  %vm417_vm0 = vcmask (!%p1856_p5), 7168   ;;  %v2307_v16 = vmov (!%p1856_p5), -inf   ;;  %v2308_v17 = vmov (!%p1856_p5), 0.0  }
  0x4c   : > { %s2472_s12 = scalar_select %p394_p4, %s2468_s8, 7 }
  0x4d   : > { %s1850_s29 = sshll.u32 %s3470_s7, 2  ;;  %s1853_s9 = sshll.u32 %s3470_s7, 3  ;;  %418 = vst.msk [vmem:[#allocation2] sm:$0xff] (!%p1856_p5), %vm417_vm0, %v2307_v16  ;;  %419 = vst.msk [vmem:[#allocation2 + $0x8] sm:$0xff] (!%p1856_p5), %vm417_vm0, %v2307_v16 }
  0x4e   : > { %s2477_s21 = scalar_lea.vmem %s3331_s0, %s1850_s29  ;;  %s396_s30 = scalar_lea.vmem %s3333_s2, %s2472_s12  ;;  %420 = vst.msk [vmem:[#allocation2 + $0x10] sm:$0xff] (!%p1856_p5), %vm417_vm0, %v2307_v16  ;;  %421 = vst.msk [vmem:[#allocation2 + $0x18] sm:$0xff] (!%p1856_p5), %vm417_vm0, %v2307_v16 }
  0x4f   : > { %s2486_s11 = scalar_lea.vmem %s3334_s3, %s1853_s9  ;;  %s2491_s20 = scalar_lea.vmem %s3336_s5, %s1853_s9  ;;  %422 = vst.msk [vmem:[#allocation2 + $0x20] sm:$0xff] (!%p1856_p5), %vm417_vm0, %v2307_v16  ;;  %423 = vst.msk [vmem:[#allocation2 + $0x28] sm:$0xff] (!%p1856_p5), %vm417_vm0, %v2307_v16 }
  0x50   : > { %s2493_s7 = scalar_lea.vmem [#allocation5], %s1847_s17  ;;  %416 = sbr.rel (%p1856_p5) target bundleno = 101 (0x65), region = 78  ;;  %424 = vst.msk [vmem:[#allocation2 + $0x30] sm:$0xff] (!%p1856_p5), %vm417_vm0, %v2307_v16  ;;  %425 = vst.msk [vmem:[#allocation2 + $0x38] sm:$0xff] (!%p1856_p5), %vm417_vm0, %v2307_v16 }
  0x51   : > { %426 = vst.msk [vmem:[#allocation2 + $0x40] sm:$0xff] (!%p1856_p5), %vm417_vm0, %v2307_v16  ;;  %427 = vst.msk [vmem:[#allocation2 + $0x48] sm:$0xff] (!%p1856_p5), %vm417_vm0, %v2307_v16 }
  0x52   : > { %428 = vst.msk [vmem:[#allocation2 + $0x50] sm:$0xff] (!%p1856_p5), %vm417_vm0, %v2307_v16  ;;  %429 = vst.msk [vmem:[#allocation2 + $0x58] sm:$0xff] (!%p1856_p5), %vm417_vm0, %v2307_v16 }
  0x53   : > { %430 = vst.msk [vmem:[#allocation2 + $0x60] sm:$0xff] (!%p1856_p5), %vm417_vm0, %v2307_v16  ;;  %431 = vst.msk [vmem:[#allocation2 + $0x68] sm:$0xff] (!%p1856_p5), %vm417_vm0, %v2307_v16 }
  0x54   : > { %432 = vst.msk [vmem:[#allocation2 + $0x70] sm:$0xff] (!%p1856_p5), %vm417_vm0, %v2307_v16  ;;  %433 = vst.msk [vmem:[#allocation2 + $0x78] sm:$0xff] (!%p1856_p5), %vm417_vm0, %v2307_v16 }
  0x55   : > { %434 = vst.msk [vmem:[#allocation3] sm:$0xff] (!%p1856_p5), %vm417_vm0, %v2308_v17  ;;  %435 = vst.msk [vmem:[#allocation3 + $0x8] sm:$0xff] (!%p1856_p5), %vm417_vm0, %v2308_v17 }
  0x56   : > { %436 = vst.msk [vmem:[#allocation3 + $0x10] sm:$0xff] (!%p1856_p5), %vm417_vm0, %v2308_v17  ;;  %437 = vst.msk [vmem:[#allocation3 + $0x18] sm:$0xff] (!%p1856_p5), %vm417_vm0, %v2308_v17 }
  0x57   : > { %438 = vst.msk [vmem:[#allocation3 + $0x20] sm:$0xff] %vm417_vm0, %v2308_v17  ;;  %439 = vst.msk [vmem:[#allocation3 + $0x28] sm:$0xff] %vm417_vm0, %v2308_v17 }
  0x58   : > { %440 = vst.msk [vmem:[#allocation3 + $0x30] sm:$0xff] %vm417_vm0, %v2308_v17  ;;  %441 = vst.msk [vmem:[#allocation3 + $0x38] sm:$0xff] %vm417_vm0, %v2308_v17 }
  0x59   : > { %442 = vst.msk [vmem:[#allocation3 + $0x40] sm:$0xff] %vm417_vm0, %v2308_v17  ;;  %443 = vst.msk [vmem:[#allocation3 + $0x48] sm:$0xff] %vm417_vm0, %v2308_v17 }
  0x5a   : > { %444 = vst.msk [vmem:[#allocation3 + $0x50] sm:$0xff] %vm417_vm0, %v2308_v17  ;;  %445 = vst.msk [vmem:[#allocation3 + $0x58] sm:$0xff] %vm417_vm0, %v2308_v17 }
  0x5b   : > { %446 = vst.msk [vmem:[#allocation3 + $0x60] sm:$0xff] %vm417_vm0, %v2308_v17  ;;  %447 = vst.msk [vmem:[#allocation3 + $0x68] sm:$0xff] %vm417_vm0, %v2308_v17 }
  0x5c   : > { %448 = vst.msk [vmem:[#allocation3 + $0x70] sm:$0xff] %vm417_vm0, %v2308_v17  ;;  %449 = vst.msk [vmem:[#allocation3 + $0x78] sm:$0xff] %vm417_vm0, %v2308_v17 }
  0x5d   : > { %450 = vst.msk [vmem:[#allocation4] sm:$0xff] %vm417_vm0, %v2308_v17  ;;  %451 = vst.msk [vmem:[#allocation4 + $0x8] sm:$0xff] %vm417_vm0, %v2308_v17 }
  0x5e   : > { %452 = vst.msk [vmem:[#allocation4 + $0x10] sm:$0xff] %vm417_vm0, %v2308_v17  ;;  %453 = vst.msk [vmem:[#allocation4 + $0x18] sm:$0xff] %vm417_vm0, %v2308_v17 }
  0x5f   : > { %454 = vst.msk [vmem:[#allocation4 + $0x20] sm:$0xff] %vm417_vm0, %v2308_v17  ;;  %455 = vst.msk [vmem:[#allocation4 + $0x28] sm:$0xff] %vm417_vm0, %v2308_v17 }
  0x60   : > { %456 = vst.msk [vmem:[#allocation4 + $0x30] sm:$0xff] %vm417_vm0, %v2308_v17  ;;  %457 = vst.msk [vmem:[#allocation4 + $0x38] sm:$0xff] %vm417_vm0, %v2308_v17 }
  0x61   : > { %458 = vst.msk [vmem:[#allocation4 + $0x40] sm:$0xff] %vm417_vm0, %v2308_v17  ;;  %459 = vst.msk [vmem:[#allocation4 + $0x48] sm:$0xff] %vm417_vm0, %v2308_v17 }
  0x62   : > { %460 = vst.msk [vmem:[#allocation4 + $0x50] sm:$0xff] %vm417_vm0, %v2308_v17  ;;  %461 = vst.msk [vmem:[#allocation4 + $0x58] sm:$0xff] %vm417_vm0, %v2308_v17 }
  0x63   : > { %462 = vst.msk [vmem:[#allocation4 + $0x60] sm:$0xff] %vm417_vm0, %v2308_v17  ;;  %463 = vst.msk [vmem:[#allocation4 + $0x68] sm:$0xff] %vm417_vm0, %v2308_v17 }
  0x64   : > { %464 = vst.msk [vmem:[#allocation4 + $0x70] sm:$0xff] %vm417_vm0, %v2308_v17  ;;  %465 = vst.msk [vmem:[#allocation4 + $0x78] sm:$0xff] %vm417_vm0, %v2308_v17 }
  0x65 PF: > { %v2035_v18 = vld [vmem:[%s2493_s7 + $0x4] ss:$8 sps:$4 sm:$0xff]   ;;  %v2037_v19 = vld [vmem:[%s2493_s7] ss:$8 sps:$4 sm:$0xff]   ;;  %v2309_v20 = vmov 0   ;;  %s1897_s1 = sshll.u32 %s2289_s23, 8  ;;  %v3345_v2 = vlaneseq }
  0x66   : > { %670 = vmatprep.mubr.bf16.mxu0 %v2309_v20  ;;  %710 = vmatprep.mubr.bf16.mxu1 %v2309_v20  ;;  %v2038_v21 = vld [vmem:[%s2493_s7 + $0x14] ss:$8 sps:$4 sm:$0xff]   ;;  %v2040_v22 = vld [vmem:[%s2493_s7 + $0x10] ss:$8 sps:$4 sm:$0xff]   ;;  %v2041_v23 = vld [vmem:[%s2493_s7 + $0x24] ss:$8 sps:$4 sm:$0xff]   ;;  %v2562_v30 = vstv %s1897_s1 }
  0x67   : > { %638 = vmatprep.subr.bf16.mxu0 %v2035_v18  ;;  %1924 = vmatprep.subr.bf16.mxu1 %v2035_v18  ;;  %v2043_v24 = vld [vmem:[%s2493_s7 + $0x20] ss:$8 sps:$4 sm:$0xff]   ;;  %v2044_v25 = vld [vmem:[%s2493_s7 + $0x34] ss:$8 sps:$4 sm:$0xff]   ;;  %v2046_v26 = vld [vmem:[%s2493_s7 + $0x30] ss:$8 sps:$4 sm:$0xff]  }
  0x68   : > { %639 = vmatpush1.bf16.msra.mxu0 %v2037_v19  ;;  %1932 = vmatpush1.bf16.msra.mxu1 %v2037_v19  ;;  %v2047_v27 = vld [vmem:[%s2493_s7 + $0x44] ss:$8 sps:$4 sm:$0xff]   ;;  %v2049_v28 = vld [vmem:[%s2493_s7 + $0x40] ss:$8 sps:$4 sm:$0xff]   ;;  %v2050_v29 = vld [vmem:[%s2493_s7 + $0x54] ss:$8 sps:$4 sm:$0xff]  }
  0x69   : > { %640 = vmatprep.subr.bf16.mxu0 %v2038_v21  ;;  %1925 = vmatprep.subr.bf16.mxu1 %v2038_v21  ;;  %v1299_v31 = vld [vmem:[%s2486_s11] sm:$0xff]  ;;  %v2052_v32 = vld [vmem:[%s2493_s7 + $0x50] ss:$8 sps:$4 sm:$0xff]   ;;  %v1300_v35 = vld [vmem:[%s2486_s11 + $0x8] sm:$0xff]  ;;  %v501_v3 = vshrl.u32 %v3345_v2, 7  ;;  %vm1263_vm1 = vcmask 7168  }
  0x6a   : > { %2033 = vset.pattern.permute.xlu1 %v2309_v20  ;;  %2034 = vset.pattern.permute.xlu0 %v2309_v20  ;;  %v1317_v33 = vsub.s32 %v1299_v31, %v2562_v30  ;;  %v1301_v34 = vld [vmem:[%s2486_s11 + $0x10] sm:$0xff]  ;;  %v2053_v36 = vld [vmem:[%s2493_s7 + $0x64] ss:$8 sps:$4 sm:$0xff]   ;;  %v1318_v37 = vsub.s32 %v1300_v35, %v2562_v30  ;;  %v1302_v40 = vld [vmem:[%s2486_s11 + $0x18] sm:$0xff]  ;;  %p1898_p6 = scmp.ne.s32.totalorder %s2289_s23, 3 }
  0x6b   : > { %v1303_v38 = vld [vmem:[%s2486_s11 + $0x20] sm:$0xff]  ;;  %v1319_v39 = vsub.s32 %v1301_v34, %v2562_v30  ;;  %v1305_v43 = vld [vmem:[%s2486_s11 + $0x30] sm:$0xff]  ;;  %v1320_v45 = vsub.s32 %v1302_v40, %v2562_v30  ;;  %v1304_v46 = vld [vmem:[%s2486_s11 + $0x28] sm:$0xff]  ;;  %v502_v4 = vsub.s32 0, %v501_v3  ;;  %v506_v6 = vsub.s32 1, %v501_v3 }
  0x6c   : > { %641 = vmatpush1.bf16.msra.mxu0 %v2040_v22  ;;  %1933 = vmatpush1.bf16.msra.mxu1 %v2040_v22  ;;  %v1321_v41 = vsub.s32 %v1303_v38, %v2562_v30  ;;  %v2055_v42 = vld [vmem:[%s2493_s7 + $0x60] ss:$8 sps:$4 sm:$0xff]   ;;  %v2056_v44 = vld [vmem:[%s2493_s7 + $0x74] ss:$8 sps:$4 sm:$0xff]   ;;  %v1323_v47 = vsub.s32 %v1305_v43, %v2562_v30  ;;  %v2058_v48 = vld [vmem:[%s2493_s7 + $0x70] ss:$8 sps:$4 sm:$0xff]   ;;  %v1322_v49 = vsub.s32 %v1304_v46, %v2562_v30 }
  0x6d   : > { %642 = vmatprep.subr.bf16.mxu0 %v2041_v23  ;;  %1926 = vmatprep.subr.bf16.mxu1 %v2041_v23  ;;  %v1307_v50 = vld [vmem:[%s2486_s11 + $0x40] sm:$0xff]  ;;  %v1306_v53 = vld [vmem:[%s2486_s11 + $0x38] sm:$0xff]  ;;  %v1309_v56 = vld [vmem:[%s2486_s11 + $0x50] sm:$0xff] }
  0x6e   : > { %1334 = vperm.xlu1 %2033, %v1317_v33   ;;  %1337 = vperm.xlu0 %2034, %v1318_v37   ;;  %v2059_v51 = vld [vmem:[%s2477_s21] sm:$0xff]   ;;  %v1325_v54 = vsub.s32 %v1307_v50, %v2562_v30  ;;  %v1324_v55 = vsub.s32 %v1306_v53, %v2562_v30  ;;  %v1308_v57 = vld [vmem:[%s2486_s11 + $0x48] sm:$0xff]  ;;  %v1327_v58 = vsub.s32 %v1309_v56, %v2562_v30  ;;  %v2063_v62 = vld [vmem:[%s2477_s21 + $0x10] sm:$0xff]  }
  0x6f   : > { %v2060_v52 = vld [vmem:[%s2477_s21 + $0x20] sm:$0xff]   ;;  %v1326_v59 = vsub.s32 %v1308_v57, %v2562_v30  ;;  %v2061_v60 = vld [vmem:[%s2477_s21 + $0x8] sm:$0xff]   ;;  %v2064_v63 = vld [vmem:[%s2477_s21 + $0x30] sm:$0xff]  }
  0x70   : > { %643 = vmatpush1.bf16.msra.mxu0 %v2043_v24  ;;  %1934 = vmatpush1.bf16.msra.mxu1 %v2043_v24  ;;  %v2062_v61 = vld [vmem:[%s2477_s21 + $0x28] sm:$0xff]   ;;  %v2065_v0 = vld [vmem:[%s2477_s21 + $0x18] sm:$0xff]   ;;  %v498_v5 = vld [vmem:[%s396_s30] sm:$0x3] }
  0x71   : > { %644 = vmatprep.subr.bf16.mxu0 %v2044_v25  ;;  %1927 = vmatprep.subr.bf16.mxu1 %v2044_v25  ;;  %v2066_v1 = vld [vmem:[%s2477_s21 + $0x38] sm:$0xff]   ;;  %v2611_v7 = vrot.slane %v498_v5, %v502_v4  ;;  %v2613_v8 = vrot.slane %v498_v5, %v506_v6 }
  0x72   : > { %1340 = vperm.xlu1 %2033, %v1319_v39   ;;  %1346 = vperm.xlu0 %2034, %v1321_v41  }
  0x74   : > { %645 = vmatpush1.bf16.msra.mxu0 %v2046_v26  ;;  %1935 = vmatpush1.bf16.msra.mxu1 %v2046_v26 }
  0x75   : > { %646 = vmatprep.subr.bf16.mxu0 %v2047_v27  ;;  %1928 = vmatprep.subr.bf16.mxu1 %v2047_v27 }
  0x76   : > { %1343 = vperm.xlu1 %2033, %v1320_v45   ;;  %1352 = vperm.xlu0 %2034, %v1323_v47  }
  0x78   : > { %647 = vmatpush1.bf16.msra.mxu0 %v2049_v28  ;;  %1936 = vmatpush1.bf16.msra.mxu1 %v2049_v28 }
  0x79   : > { %648 = vmatprep.subr.bf16.mxu0 %v2050_v29  ;;  %1929 = vmatprep.subr.bf16.mxu1 %v2050_v29 }
  0x7a   : > { %1349 = vperm.xlu1 %2033, %v1322_v49   ;;  %1358 = vperm.xlu0 %2034, %v1325_v54  }
  0x7c   : > { %649 = vmatpush1.bf16.msra.mxu0 %v2052_v32  ;;  %1937 = vmatpush1.bf16.msra.mxu1 %v2052_v32 }
  0x7d   : > { %650 = vmatprep.subr.bf16.mxu0 %v2053_v36  ;;  %1930 = vmatprep.subr.bf16.mxu1 %v2053_v36 }
  0x7e   : > { %1355 = vperm.xlu1 %2033, %v1324_v55   ;;  %1364 = vperm.xlu0 %2034, %v1327_v58  }
  0x80   : > { %651 = vmatpush1.bf16.msra.mxu0 %v2055_v42  ;;  %1938 = vmatpush1.bf16.msra.mxu1 %v2055_v42 }
  0x81   : > { %652 = vmatprep.subr.bf16.mxu0 %v2056_v44  ;;  %1931 = vmatprep.subr.bf16.mxu1 %v2056_v44 }
  0x82   : > { %1361 = vperm.xlu1 %2033, %v1326_v59  }
  0x84   : > { %653 = vmatpush1.bf16.msra.mxu0 %v2058_v48  ;;  %1939 = vmatpush1.bf16.msra.mxu1 %v2058_v48 }
  0x87   : > { %671 = vmatmul.mubr.bf16.vlgmr.msra.gmra.mrb[0].mxu0 %v2059_v51  ;;  %711 = vmatmul.mubr.bf16.vlgmr.msra.gmra.mrb[0].mxu1 %v2060_v52 }
  0x88   : > { %680 = vmatprep.mubr.bf16.mxu0 %v2309_v20  ;;  %720 = vmatprep.mubr.bf16.mxu1 %v2309_v20 }
  0x8f   : > { %681 = vmatmul.mubr.bf16.gmra.mrb[4].mxu0 %v2061_v60  ;;  %721 = vmatmul.mubr.bf16.gmra.mrb[4].mxu1 %v2062_v61 }
  0x90   : > { %690 = vmatprep.mubr.bf16.mxu0 %v2309_v20  ;;  %730 = vmatprep.mubr.bf16.mxu1 %v2309_v20 }
  0x97   : > { %691 = vmatmul.mubr.bf16.gmra.mrb[8].mxu0 %v2063_v62  ;;  %731 = vmatmul.mubr.bf16.gmra.mrb[8].mxu1 %v2064_v63 }
  0x98   : > { %700 = vmatprep.mubr.bf16.mxu0 %v2309_v20  ;;  %740 = vmatprep.mubr.bf16.mxu1 %v2309_v20 }
  0x9f   : > { %701 = vmatmul.mubr.bf16.gmra.mrb[12].mxu0 %v2065_v0  ;;  %741 = vmatmul.mubr.bf16.gmra.mrb[12].mxu1 %v2066_v1 }
 0x15a   : > { %v672_v9 = vpop.f32.mrb[0].mxu0  ;;  %v712_v10 = vpop.f32.mrb[0].mxu1 }
 0x15b   : > { %v2616_v11 = vadd.f32 %v672_v9, %v2611_v7  ;;  %v2619_v12 = vadd.f32 %v712_v10, %v2611_v7  ;;  %v674_v13 = vpop.f32.mrb[1].mxu0  ;;  %v714_v14 = vpop.f32.mrb[1].mxu1 }
 0x15c   : > { %v2622_v15 = vadd.f32 %v674_v13, %v2613_v8  ;;  %v2625_v16 = vadd.f32 %v714_v14, %v2613_v8  ;;  %v676_v17 = vpop.f32.mrb[2].mxu0  ;;  %v716_v18 = vpop.f32.mrb[2].mxu1 }
 0x15d   : > { %v2628_v19 = vadd.f32 %v676_v17, %v2611_v7  ;;  %v2631_v20 = vadd.f32 %v716_v18, %v2611_v7  ;;  %v678_v21 = vpop.f32.mrb[3].mxu0  ;;  %v718_v22 = vpop.f32.mrb[3].mxu1 }
 0x15e   : > { %v1907_v23 = vpack.c.bf16 %v2622_v15, %v2616_v11  ;;  %v1915_v24 = vpack.c.bf16 %v2625_v16, %v2619_v12  ;;  %v2638_v25 = vadd.f32 %v678_v21, %v2613_v8  ;;  %v2641_v26 = vadd.f32 %v718_v22, %v2613_v8 }
 0x15f   : > { %v879_v27 = vmax.f32 %v2616_v11, %v2622_v15  ;;  %v903_v36 = vmax.f32 %v2619_v12, %v2625_v16 }
 0x160   : > { %847 = vst [vmem:[%s2495_s16] sm:$0xff] %v1907_v23  ;;  %855 = vst [vmem:[%s2495_s16 + $0x40] sm:$0xff] %v1915_v24  ;;  %v1908_v28 = vpack.c.bf16 %v2638_v25, %v2628_v19  ;;  %v1916_v29 = vpack.c.bf16 %v2641_v26, %v2631_v20  ;;  %v906_v31 = vmax.f32 %v2631_v20, %v2641_v26 }
 0x161   : > { %880 = vmax.xlane.f32.xlu0 %v879_v27  ;;  %v882_v52 = vmax.f32 %v2628_v19, %v2638_v25 }
 0x162   : > { %848 = vst [vmem:[%s2495_s16 + $0x8] sm:$0xff] %v1908_v28  ;;  %856 = vst [vmem:[%s2495_s16 + $0x48] sm:$0xff] %v1916_v29  ;;  %907 = vmax.xlane.f32.xlu1 %v906_v31  ;;  %v682_v32 = vpop.f32.mrb[4].mxu0  ;;  %v722_v33 = vpop.f32.mrb[4].mxu1 }
 0x163   : > { %v2656_v34 = vadd.f32 %v682_v32, %v2611_v7  ;;  %v684_v35 = vpop.f32.mrb[5].mxu0  ;;  %v2661_v37 = vadd.f32 %v722_v33, %v2611_v7  ;;  %v724_v38 = vpop.f32.mrb[5].mxu1 }
 0x164   : > { %v2664_v39 = vadd.f32 %v684_v35, %v2613_v8  ;;  %v686_v40 = vpop.f32.mrb[6].mxu0  ;;  %v2667_v41 = vadd.f32 %v724_v38, %v2613_v8  ;;  %v726_v42 = vpop.f32.mrb[6].mxu1 }
 0x165   : > { %v2670_v43 = vadd.f32 %v686_v40, %v2611_v7  ;;  %904 = vmax.xlane.f32.xlu0 %v903_v36  ;;  %v688_v44 = vpop.f32.mrb[7].mxu0  ;;  %v2673_v45 = vadd.f32 %v726_v42, %v2611_v7  ;;  %v728_v46 = vpop.f32.mrb[7].mxu1 }
 0x166   : > { %v1909_v47 = vpack.c.bf16 %v2664_v39, %v2656_v34  ;;  %v2678_v48 = vadd.f32 %v688_v44, %v2613_v8  ;;  %v1917_v49 = vpack.c.bf16 %v2667_v41, %v2661_v37  ;;  %v2683_v50 = vadd.f32 %v728_v46, %v2613_v8 }
 0x167   : > { %v885_v51 = vmax.f32 %v2656_v34, %v2664_v39  ;;  %v909_v55 = vmax.f32 %v2661_v37, %v2667_v41 }
 0x168   : > { %849 = vst [vmem:[%s2495_s16 + $0x10] sm:$0xff] %v1909_v47  ;;  %v1910_v53 = vpack.c.bf16 %v2678_v48, %v2670_v43  ;;  %857 = vst [vmem:[%s2495_s16 + $0x50] sm:$0xff] %v1917_v49  ;;  %v1918_v54 = vpack.c.bf16 %v2683_v50, %v2673_v45  ;;  %v888_v60 = vmax.f32 %v2670_v43, %v2678_v48 }
 0x169   : > { %886 = vmax.xlane.f32.xlu1 %v885_v51  ;;  %883 = vmax.xlane.f32.xlu0 %v882_v52  ;;  %v912_v18 = vmax.f32 %v2673_v45, %v2683_v50 }
 0x16a   : > { %850 = vst [vmem:[%s2495_s16 + $0x18] sm:$0xff] %v1910_v53  ;;  %858 = vst [vmem:[%s2495_s16 + $0x58] sm:$0xff] %v1918_v54  ;;  %v692_v56 = vpop.f32.mrb[8].mxu0  ;;  %v732_v57 = vpop.f32.mrb[8].mxu1 }
 0x16b   : > { %v2700_v58 = vadd.f32 %v692_v56, %v2611_v7  ;;  %v694_v59 = vpop.f32.mrb[9].mxu0  ;;  %v2705_v61 = vadd.f32 %v732_v57, %v2611_v7  ;;  %v734_v62 = vpop.f32.mrb[9].mxu1 }
 0x16c   : > { %v2708_v63 = vadd.f32 %v694_v59, %v2613_v8  ;;  %v696_v0 = vpop.f32.mrb[10].mxu0  ;;  %v2711_v1 = vadd.f32 %v734_v62, %v2613_v8  ;;  %v736_v3 = vpop.f32.mrb[10].mxu1 }
 0x16d   : > { %v2714_v4 = vadd.f32 %v696_v0, %v2611_v7  ;;  %889 = vmax.xlane.f32.xlu1 %v888_v60  ;;  %v698_v5 = vpop.f32.mrb[11].mxu0  ;;  %910 = vmax.xlane.f32.xlu0 %v909_v55  ;;  %v2717_v6 = vadd.f32 %v736_v3, %v2611_v7  ;;  %v738_v9 = vpop.f32.mrb[11].mxu1 }
 0x16e   : > { %v1911_v10 = vpack.c.bf16 %v2708_v63, %v2700_v58  ;;  %v2722_v13 = vadd.f32 %v698_v5, %v2613_v8  ;;  %v1919_v14 = vpack.c.bf16 %v2711_v1, %v2705_v61  ;;  %v2727_v17 = vadd.f32 %v738_v9, %v2613_v8  ;;  %v2791_v62 = vpop.permute.xlu1 %1334  ;;  %v2795_v3 = vpop.permute.xlu0 %1337 }
 0x16f   : > { %v891_v21 = vmax.f32 %v2700_v58, %v2708_v63  ;;  %v915_v24 = vmax.f32 %v2705_v61, %v2711_v1 }
 0x170   : > { %851 = vst [vmem:[%s2495_s16 + $0x20] sm:$0xff] %v1911_v10  ;;  %v1912_v22 = vpack.c.bf16 %v2722_v13, %v2714_v4  ;;  %859 = vst [vmem:[%s2495_s16 + $0x60] sm:$0xff] %v1919_v14  ;;  %v1920_v23 = vpack.c.bf16 %v2727_v17, %v2717_v6  ;;  %v894_v29 = vmax.f32 %v2714_v4, %v2722_v13 }
 0x171   : > { %913 = vmax.xlane.f32.xlu1 %v912_v18  ;;  %892 = vmax.xlane.f32.xlu0 %v891_v21  ;;  %v918_v55 = vmax.f32 %v2717_v6, %v2727_v17 }
 0x172   : > { %852 = vst [vmem:[%s2495_s16 + $0x28] sm:$0xff] %v1912_v22  ;;  %860 = vst [vmem:[%s2495_s16 + $0x68] sm:$0xff] %v1920_v23  ;;  %v702_v27 = vpop.f32.mrb[12].mxu0  ;;  %v742_v28 = vpop.f32.mrb[12].mxu1 }
 0x173   : > { %v2746_v31 = vadd.f32 %v702_v27, %v2611_v7  ;;  %v704_v32 = vpop.f32.mrb[13].mxu0  ;;  %v744_v33 = vpop.f32.mrb[13].mxu1  ;;  %v2752_v36 = vadd.f32 %v742_v28, %v2611_v7  ;;  %v2815_v27 = vld [vmem:[#allocation2 + $0x48] sm:$0xff] }
 0x174   : > { %v2749_v35 = vadd.f32 %v704_v32, %v2613_v8  ;;  %v2755_v38 = vadd.f32 %v744_v33, %v2613_v8  ;;  %v706_v40 = vpop.f32.mrb[14].mxu0  ;;  %v746_v42 = vpop.f32.mrb[14].mxu1  ;;  %3385 = vst [vmem:[#allocation18_spill] sm:$0xff] %v2815_v27 }
 0x175   : > { %895 = vmax.xlane.f32.xlu1 %v894_v29  ;;  %916 = vmax.xlane.f32.xlu0 %v915_v24  ;;  %v2758_v44 = vadd.f32 %v706_v40, %v2611_v7  ;;  %v708_v46 = vpop.f32.mrb[15].mxu0  ;;  %v2761_v47 = vadd.f32 %v746_v42, %v2611_v7  ;;  %v748_v49 = vpop.f32.mrb[15].mxu1  ;;  %v2813_v24 = vld [vmem:[#allocation2] sm:$0xff] }
 0x176   : > { %v1913_v51 = vpack.c.bf16 %v2749_v35, %v2746_v31  ;;  %v1921_v52 = vpack.c.bf16 %v2755_v38, %v2752_v36  ;;  %v897_v53 = vmax.f32 %v2746_v31, %v2749_v35  ;;  %v2770_v54 = vadd.f32 %v708_v46, %v2613_v8  ;;  %v2793_v0 = vpop.permute.xlu1 %1340  ;;  %v2799_v9 = vpop.permute.xlu0 %1346  ;;  %v2823_v40 = vld [vmem:[#allocation2 + $0x40] sm:$0xff] }
 0x177   : > { %v2775_v7 = vadd.f32 %v748_v49, %v2613_v8  ;;  %v921_v57 = vmax.f32 %v2752_v36, %v2755_v38  ;;  %3387 = vst [vmem:[#allocation20_spill] sm:$0xff] %v2823_v40  ;;  %v2874_v42 = vld [vmem:[#allocation2 + $0x20] sm:$0xff] }
 0x178   : > { %853 = vst [vmem:[%s2495_s16 + $0x30] sm:$0xff] %v1913_v51  ;;  %861 = vst [vmem:[%s2495_s16 + $0x70] sm:$0xff] %v1921_v52  ;;  %v1914_v56 = vpack.c.bf16 %v2770_v54, %v2758_v44  ;;  %v900_v59 = vmax.f32 %v2758_v44, %v2770_v54  ;;  %v2837_v52 = vld [vmem:[#allocation2 + $0x10] sm:$0xff] }
 0x179   : > { %919 = vmax.xlane.f32.xlu1 %v918_v55  ;;  %898 = vmax.xlane.f32.xlu0 %v897_v53  ;;  %v1922_v60 = vpack.c.bf16 %v2775_v7, %v2761_v47  ;;  %v924_v8 = vmax.f32 %v2761_v47, %v2775_v7  ;;  %3389 = vst [vmem:[#allocation22_spill] sm:$0xff] %v2837_v52  ;;  %v2839_v53 = vld [vmem:[#allocation2 + $0x8] sm:$0xff]  ;;  %3394 = vst [vmem:[#allocation27_spill] sm:$0xff] %v2874_v42 }
 0x17a   : > { %854 = vst [vmem:[%s2495_s16 + $0x38] sm:$0xff] %v1914_v56  ;;  %v2797_v5 = vpop.permute.xlu1 %1343  ;;  %v2803_v14 = vpop.permute.xlu0 %1352  ;;  %3390 = vst [vmem:[#allocation23_spill] sm:$0xff] %v2839_v53 }
 0x17b   : > { %862 = vst [vmem:[%s2495_s16 + $0x78] sm:$0xff] %v1922_v60 }
 0x17d   : > { %922 = vmax.xlane.f32.xlu0 %v921_v57  ;;  %901 = vmax.xlane.f32.xlu1 %v900_v59 }
 0x17e   : > { %v2801_v10 = vpop.permute.xlu1 %1349  ;;  %v2807_v21 = vpop.permute.xlu0 %1358 }
 0x181   : > { %925 = vmax.xlane.f32.xlu1 %v924_v8  ;;  %v2853_v8 = vld [vmem:[#allocation2 + $0x18] sm:$0xff] }
 0x182   : > { %v2805_v18 = vpop.permute.xlu1 %1355  ;;  %v2809_v22 = vpop.permute.xlu0 %1364 }
 0x186   : > { %v2811_v23 = vpop.permute.xlu1 %1361 }
 0x1ee   : > { %v881_v28 = vpop.xlane.xlu0 %880 }
 0x1ef   : > { %v2818_v29 = vmax.f32 %v2813_v24, %v881_v28  ;;  %v908_v32 = vpop.xlane.xlu1 %907  ;;  %v2855_v28 = vld [vmem:[#allocation2 + $0x50] sm:$0xff] }
 0x1f0   : > { %v2821_v33 = vmax.f32 %v2815_v27, %v908_v32  ;;  %v2872_v32 = vld [vmem:[#allocation2 + $0x58] sm:$0xff]  ;;  %v2893_v27 = vld [vmem:[#allocation2 + $0x60] sm:$0xff] }
 0x1f1   : > { %1280 = vst.msk [vmem:[#allocation2] sm:$0xff] %vm1263_vm1, %v2818_v29  ;;  %1025 = vperm.xlu0 %2034, %v2818_v29   ;;  %3393 = vst [vmem:[#allocation26_spill] sm:$0xff] %v2872_v32 }
 0x1f2   : > { %3386 = vst [vmem:[#allocation19_spill] sm:$0xff] %v2821_v33  ;;  %1289 = vst.msk [vmem:[#allocation2 + $0x48] sm:$0xff] %vm1263_vm1, %v2821_v33  ;;  %v905_v49 = vpop.xlane.xlu0 %904 }
 0x1f3   : > { %v2835_v51 = vmax.f32 %v2823_v40, %v905_v49  ;;  %v2891_v49 = vld [vmem:[#allocation2 + $0x28] sm:$0xff]  ;;  %3398 = vst [vmem:[#allocation31_spill] sm:$0xff] %v2893_v27  ;;  %v2932_v40 = vld [vmem:[#allocation2 + $0x38] sm:$0xff] }
 0x1f4   : > { %3397 = vst [vmem:[#allocation30_spill] sm:$0xff] %v2891_v49  ;;  %3405 = vst [vmem:[#allocation38_spill] sm:$0xff] %v2932_v40 }
 0x1f5   : > { %3388 = vst [vmem:[#allocation21_spill] sm:$0xff] %v2835_v51  ;;  %1288 = vst.msk [vmem:[#allocation2 + $0x40] sm:$0xff] %vm1263_vm1, %v2835_v51  ;;  %1070 = vperm.xlu0 %2034, %v2821_v33   ;;  %1065 = vperm.xlu1 %2033, %v2835_v51  }
 0x1f6   : > { %v887_v56 = vpop.xlane.xlu1 %886  ;;  %v884_v57 = vpop.xlane.xlu0 %883 }
 0x1f7   : > { %v2848_v59 = vmax.f32 %v2837_v52, %v887_v56  ;;  %v2851_v60 = vmax.f32 %v2839_v53, %v884_v57  ;;  %v2913_v53 = vld [vmem:[#allocation2 + $0x30] sm:$0xff] }
 0x1f8   : > { %3401 = vst [vmem:[#allocation34_spill] sm:$0xff] %v2913_v53 }
 0x1f9   : > { %3391 = vst [vmem:[#allocation24_spill] sm:$0xff] %v2848_v59  ;;  %3392 = vst [vmem:[#allocation25_spill] sm:$0xff] %v2851_v60  ;;  %1030 = vperm.xlu1 %2033, %v2851_v60  }
 0x1fa   : > { %1282 = vst.msk [vmem:[#allocation2 + $0x10] sm:$0xff] %vm1263_vm1, %v2848_v59  ;;  %1281 = vst.msk [vmem:[#allocation2 + $0x8] sm:$0xff] %vm1263_vm1, %v2851_v60  ;;  %v890_v56 = vpop.xlane.xlu1 %889  ;;  %v911_v57 = vpop.xlane.xlu0 %910 }
 0x1fb   : > { %v2867_v46 = vmax.f32 %v2853_v8, %v890_v56  ;;  %v2870_v55 = vmax.f32 %v2855_v28, %v911_v57 }
 0x1fd   : > { %1283 = vst.msk [vmem:[#allocation2 + $0x18] sm:$0xff] %vm1263_vm1, %v2867_v46  ;;  %1290 = vst.msk [vmem:[#allocation2 + $0x50] sm:$0xff] %vm1263_vm1, %v2870_v55  ;;  %1035 = vperm.xlu1 %2033, %v2848_v59   ;;  %v2930_v59 = vld [vmem:[#allocation2 + $0x70] sm:$0xff] }
 0x1fe   : > { %v914_v56 = vpop.xlane.xlu1 %913  ;;  %v893_v57 = vpop.xlane.xlu0 %892  ;;  %3404 = vst [vmem:[#allocation37_spill] sm:$0xff] %v2930_v59 }
 0x1ff   : > { %v2886_v52 = vmax.f32 %v2872_v32, %v914_v56  ;;  %v2889_v33 = vmax.f32 %v2874_v42, %v893_v57  ;;  %v2911_v32 = vld [vmem:[#allocation2 + $0x68] sm:$0xff] }
 0x200   : > { %3400 = vst [vmem:[#allocation33_spill] sm:$0xff] %v2911_v32 }
 0x201   : > { %3395 = vst [vmem:[#allocation28_spill] sm:$0xff] %v2886_v52  ;;  %3396 = vst [vmem:[#allocation29_spill] sm:$0xff] %v2889_v33  ;;  %1080 = vperm.xlu0 %2034, %v2886_v52   ;;  %1075 = vperm.xlu1 %2033, %v2870_v55  }
 0x202   : > { %1291 = vst.msk [vmem:[#allocation2 + $0x58] sm:$0xff] %vm1263_vm1, %v2886_v52  ;;  %1284 = vst.msk [vmem:[#allocation2 + $0x20] sm:$0xff] %vm1263_vm1, %v2889_v33  ;;  %v896_v56 = vpop.xlane.xlu1 %895  ;;  %v917_v57 = vpop.xlane.xlu0 %916 }
 0x203   : > { %v2906_v60 = vmax.f32 %v2891_v49, %v896_v56  ;;  %v2909_v2 = vmax.f32 %v2893_v27, %v917_v57 }
 0x205   : > { %3399 = vst [vmem:[#allocation32_spill] sm:$0xff] %v2909_v2  ;;  %1285 = vst.msk [vmem:[#allocation2 + $0x28] sm:$0xff] %vm1263_vm1, %v2906_v60  ;;  %1040 = vperm.xlu1 %2033, %v2867_v46  }
 0x206   : > { %1292 = vst.msk [vmem:[#allocation2 + $0x60] sm:$0xff] %vm1263_vm1, %v2909_v2  ;;  %v920_v56 = vpop.xlane.xlu1 %919  ;;  %v899_v57 = vpop.xlane.xlu0 %898 }
 0x207   : > { %v2925_v52 = vmax.f32 %v2911_v32, %v920_v56  ;;  %v2928_v51 = vmax.f32 %v2913_v53, %v899_v57  ;;  %v2950_v32 = vld [vmem:[#allocation2 + $0x78] sm:$0xff]  ;;  %v3410_v56 = vlaneseq }
 0x208   : > { %3408 = vst [vmem:[#allocation41_spill] sm:$0xff] %v2950_v32  ;;  %v1310_v53 = vld [vmem:[%s2486_s11 + $0x58] sm:$0xff] }
 0x209   : > { %3402 = vst [vmem:[#allocation35_spill] sm:$0xff] %v2925_v52  ;;  %3403 = vst [vmem:[#allocation36_spill] sm:$0xff] %v2928_v51  ;;  %1090 = vperm.xlu0 %2034, %v2925_v52   ;;  %1045 = vperm.xlu1 %2033, %v2889_v33   ;;  %v1312_v33 = vld [vmem:[%s2486_s11 + $0x68] sm:$0xff] }
 0x20a   : > { %1293 = vst.msk [vmem:[#allocation2 + $0x68] sm:$0xff] %vm1263_vm1, %v2925_v52  ;;  %1286 = vst.msk [vmem:[#allocation2 + $0x30] sm:$0xff] %vm1263_vm1, %v2928_v51  ;;  %v923_v57 = vpop.xlane.xlu0 %922  ;;  %v902_v27 = vpop.xlane.xlu1 %901 }
 0x20b   : > { %v2945_v49 = vmax.f32 %v2930_v59, %v923_v57  ;;  %v2948_v42 = vmax.f32 %v2932_v40, %v902_v27  ;;  %v2969_v59 = vand.u32 127, %v3410_v56  ;;  %v1330_v56 = vsub.s32 %v1312_v33, %v2562_v30 }
 0x20d   : > { %3406 = vst [vmem:[#allocation39_spill] sm:$0xff] %v2945_v49  ;;  %3407 = vst [vmem:[#allocation40_spill] sm:$0xff] %v2948_v42  ;;  %1085 = vperm.xlu1 %2033, %v2909_v2   ;;  %v2974_v2 = vadd.s32 128, %v2969_v59  ;;  %vm1381_vm2 = vcmp.eq.s32.totalorder %v2969_v59, %v2791_v62  ;;  %vm1385_vm4 = vcmp.eq.s32.totalorder %v2969_v59, %v2793_v0 }
 0x20e   : > { %1294 = vst.msk [vmem:[#allocation2 + $0x70] sm:$0xff] %vm1263_vm1, %v2945_v49  ;;  %1287 = vst.msk [vmem:[#allocation2 + $0x38] sm:$0xff] %vm1263_vm1, %v2948_v42  ;;  %v926_v57 = vpop.xlane.xlu1 %925  ;;  %vm1389_vm6 = vcmp.eq.s32.totalorder %v2969_v59, %v2799_v9  ;;  %vm1393_vm8 = vcmp.eq.s32.totalorder %v2969_v59, %v2803_v14  ;;  %vm1397_vm10 = vcmp.eq.s32.totalorder %v2969_v59, %v2807_v21 }
 0x20f   : > { %v2962_v27 = vmax.f32 %v2950_v32, %v926_v57  ;;  %v1328_v57 = vsub.s32 %v1310_v53, %v2562_v30  ;;  %vm1382_vm3 = vcmp.eq.s32.totalorder %v2974_v2, %v2791_v62  ;;  %vm1386_vm5 = vcmp.eq.s32.totalorder %v2974_v2, %v2793_v0 }
 0x210   : > { %v1430_v32 = vsel %vm1382_vm3, %v2622_v15, 0.0  ;;  %v1433_v62 = vsel %vm1385_vm4, %v2656_v34, 0.0  ;;  %vm1390_vm7 = vcmp.eq.s32.totalorder %v2974_v2, %v2799_v9  ;;  %v1437_v40 = vsel %vm1389_vm6, %v2700_v58, 0.0 }
 0x211   : > { %3409 = vst [vmem:[#allocation42_spill] sm:$0xff] %v2962_v27  ;;  %1050 = vperm.xlu1 %2033, %v2906_v60   ;;  %1295 = vst.msk [vmem:[#allocation2 + $0x78] sm:$0xff] %vm1263_vm1, %v2962_v27  ;;  %v1438_v0 = vsel %vm1390_vm7, %v2708_v63, 0.0  ;;  %vm1394_vm9 = vcmp.eq.s32.totalorder %v2974_v2, %v2803_v14  ;;  %vm1398_vm11 = vcmp.eq.s32.totalorder %v2974_v2, %v2807_v21 }
 0x212   : > { %vm1401_vm12 = vcmp.eq.s32.totalorder %v2969_v59, %v2809_v22  ;;  %vm1402_vm13 = vcmp.eq.s32.totalorder %v2974_v2, %v2809_v22  ;;  %vm1383_vm14 = vcmp.eq.s32.totalorder %v2969_v59, %v2795_v3  ;;  %vm1384_vm15 = vcmp.eq.s32.totalorder %v2974_v2, %v2795_v3 }
 0x213   : > { %v1432_v22 = vsel %vm1384_vm15, %v2638_v25, 0.0  ;;  %vm1387_vm0 = vcmp.eq.s32.totalorder %v2969_v59, %v2797_v5  ;;  %vm1391_vm3 = vcmp.eq.s32.totalorder %v2969_v59, %v2801_v10  ;;  %vm1392_vm4 = vcmp.eq.s32.totalorder %v2974_v2, %v2801_v10 }
 0x214   : > { %vm1396_vm6 = vcmp.eq.s32.totalorder %v2974_v2, %v2805_v18  ;;  %vm1399_vm7 = vcmp.eq.s32.totalorder %v2969_v59, %v2811_v23 }
 0x215   : > { %1055 = vperm.xlu1 %2033, %v2928_v51   ;;  %v1314_v51 = vld [vmem:[%s2486_s11 + $0x78] sm:$0xff] }
 0x216   : > { %v1332_v53 = vsub.s32 %v1314_v51, %v2562_v30  ;;  %v1473_v51 = vadd.f32 %v1438_v0, %v1437_v40  ;;  %v1449_v40 = vsel %vm1401_vm12, %v2661_v37, 0.0  ;;  %v1435_v0 = vsel %vm1387_vm0, %v2670_v43, 0.0 }
 0x219   : > { %1095 = vperm.xlu1 %2033, %v2945_v49   ;;  %v1429_v49 = vsel %vm1381_vm2, %v2616_v11, 0.0  ;;  %vm1388_vm2 = vcmp.eq.s32.totalorder %v2974_v2, %v2797_v5  ;;  %v1440_v5 = vsel %vm1392_vm4, %v2722_v13, 0.0 }
 0x21d   : > { %1060 = vperm.xlu1 %2033, %v2948_v42   ;;  %v1461_v42 = vadd.f32 %v1430_v32, %v1429_v49  ;;  %v1441_v32 = vsel %vm1393_vm8, %v2746_v31, 0.0  ;;  %v1442_v49 = vsel %vm1394_vm9, %v2749_v35, 0.0  ;;  %vm1400_vm8 = vcmp.eq.s32.totalorder %v2974_v2, %v2811_v23 }
 0x21e   : > { %v1479_v9 = vadd.f32 %v1442_v49, %v1441_v32  ;;  %v1313_v49 = vld [vmem:[%s2486_s11 + $0x70] sm:$0xff] }
 0x221   : > { %1367 = vperm.xlu1 %2033, %v1328_v57   ;;  %v1434_v57 = vsel %vm1386_vm5, %v2664_v39, 0.0  ;;  %vm1395_vm5 = vcmp.eq.s32.totalorder %v2969_v59, %v2805_v18  ;;  %v1447_v18 = vsel %vm1399_vm7, %v2631_v20, 0.0 }
 0x222   : > { %v1467_v33 = vadd.f32 %v1434_v57, %v1433_v62  ;;  %v1431_v62 = vsel %vm1383_vm14, %v2628_v19, 0.0 }
 0x223   : > { %v1464_v57 = vadd.f32 %v1432_v22, %v1431_v62 }
 0x225   : > { %1373 = vperm.xlu1 %2033, %v1330_v56   ;;  %v1446_v56 = vsel %vm1398_vm11, %v2625_v16, 0.0 }
 0x228   : > { %1462 = vadd.xlane.f32.xlu0 %v1461_v42  ;;  %v1445_v42 = vsel %vm1397_vm10, %v2619_v12, 0.0 }
 0x229   : > { %1379 = vperm.xlu1 %2033, %v1332_v53   ;;  %v1485_v14 = vadd.f32 %v1446_v56, %v1445_v42  ;;  %v1450_v53 = vsel %vm1402_vm13, %v2667_v41, 0.0  ;;  %v1331_v42 = vsub.s32 %v1313_v49, %v2562_v30  ;;  %v1443_v56 = vsel %vm1395_vm5, %v2758_v44, 0.0 }
 0x22a   : > { %v1491_v21 = vadd.f32 %v1450_v53, %v1449_v40  ;;  %v1448_v53 = vsel %vm1400_vm8, %v2641_v26, 0.0 }
 0x22c   : > { %1468 = vadd.xlane.f32.xlu0 %v1467_v33  ;;  %v1311_v33 = vld [vmem:[%s2486_s11 + $0x60] sm:$0xff] }
 0x22d   : > { %v1329_v3 = vsub.s32 %v1311_v33, %v2562_v30  ;;  %v1488_v30 = vadd.f32 %v1448_v53, %v1447_v18 }
 0x230   : > { %1474 = vadd.xlane.f32.xlu0 %v1473_v51  ;;  %v1436_v51 = vsel %vm1388_vm2, %v2678_v48, 0.0 }
 0x231   : > { %v1470_v32 = vadd.f32 %v1436_v51, %v1435_v0 }
 0x234   : > { %1480 = vadd.xlane.f32.xlu0 %v1479_v9  ;;  %v1439_v9 = vsel %vm1391_vm3, %v2714_v4, 0.0 }
 0x235   : > { %v1476_v10 = vadd.f32 %v1440_v5, %v1439_v9 }
 0x238   : > { %1486 = vadd.xlane.f32.xlu0 %v1485_v14  ;;  %v1444_v14 = vsel %vm1396_vm6, %v2770_v54, 0.0 }
 0x239   : > { %v1482_v40 = vadd.f32 %v1444_v14, %v1443_v56 }
 0x23c   : > { %1492 = vadd.xlane.f32.xlu0 %v1491_v21 }
 0x24d   : > { %1465 = vadd.xlane.f32.xlu1 %v1464_v57 }
 0x251   : > { %1471 = vadd.xlane.f32.xlu1 %v1470_v32 }
 0x252   : > { %1370 = vperm.xlu0 %2034, %v1329_v3  }
 0x255   : > { %1477 = vadd.xlane.f32.xlu1 %v1476_v10 }
 0x256   : > { %1376 = vperm.xlu0 %2034, %v1331_v42  }
 0x259   : > { %1483 = vadd.xlane.f32.xlu1 %v1482_v40 }
 0x25a   : > { %1100 = vperm.xlu0 %2034, %v2962_v27  }
 0x25d   : > { %1489 = vadd.xlane.f32.xlu1 %v1488_v30 }
 0x270   : > { %v1026_v3 = vpop.permute.xlu0 %1025 }
 0x271   : > { %v1103_v49 = vsub.f32 %v2616_v11, %v1026_v3  ;;  %v1104_v9 = vsub.f32 %v2622_v15, %v1026_v3 }
 0x273   : > { %v1135_v10 = vmul.f32 1.442695, %v1103_v49  ;;  %v1137_v14 = vmul.f32 1.442695, %v1104_v9 }
 0x274   : > { %v3053_v21 = vpop.permute.xlu1 %1065  ;;  %v3070_v56 = vpop.permute.xlu0 %1070 }
 0x275   : > { %2067 = vpow2.f32 %v1135_v10 }
 0x276   : > { %2069 = vpow2.f32 %v1137_v14 }
 0x278   : > { %v3055_v62 = vpop.permute.xlu1 %1030 }
 0x27c   : > { %v3057_v22 = vpop.permute.xlu1 %1035 }
 0x280   : > { %v1076_v57 = vpop.permute.xlu1 %1075  ;;  %v3074_v27 = vpop.permute.xlu0 %1080 }
 0x281   : > { %v1123_v5 = vsub.f32 %v2661_v37, %v1076_v57  ;;  %v1124_v40 = vsub.f32 %v2667_v41, %v1076_v57 }
 0x283   : > { %v1175_v18 = vmul.f32 1.442695, %v1123_v5  ;;  %v1177_v15 = vmul.f32 1.442695, %v1124_v40  ;;  %v2068_v40 = vpop.eup %2067 }
 0x284   : > { %v1041_v23 = vpop.permute.xlu1 %1040 }
 0x285   : > { %v1109_v53 = vsub.f32 %v2670_v43, %v1041_v23  ;;  %v1110_v11 = vsub.f32 %v2678_v48, %v1041_v23  ;;  %2071 = vpow2.f32 %v1175_v18 }
 0x286   : > { %2073 = vpow2.f32 %v1177_v15 }
 0x287   : > { %v1147_v37 = vmul.f32 1.442695, %v1109_v53  ;;  %v1149_v49 = vmul.f32 1.442695, %v1110_v11  ;;  %v2070_v53 = vpop.eup %2069 }
 0x288   : > { %v3059_v33 = vpop.permute.xlu1 %1045  ;;  %v1091_v52 = vpop.permute.xlu0 %1090 }
 0x289   : > { %2075 = vpow2.f32 %v1147_v37  ;;  %v1129_v23 = vsub.f32 %v2717_v6, %v1091_v52 }
 0x28a   : > { %2077 = vpow2.f32 %v1149_v49 }
 0x28b   : > { %v1187_v11 = vmul.f32 1.442695, %v1129_v23  ;;  %v1413_v23 = vld [vmem:[#allocation4] sm:$0xff] }
 0x28c   : > { %v3061_v0 = vpop.permute.xlu1 %1085 }
 0x28f   : > { %v2072_v37 = vpop.eup %2071 }
 0x290   : > { %v1051_v51 = vpop.permute.xlu1 %1050 }
 0x291   : > { %v1113_v9 = vsub.f32 %v2714_v4, %v1051_v51  ;;  %v1114_v41 = vsub.f32 %v2722_v13, %v1051_v51  ;;  %v1130_v4 = vsub.f32 %v2727_v17, %v1091_v52  ;;  %v2074_v52 = vpop.eup %2073 }
 0x293   : > { %v1155_v10 = vmul.f32 1.442695, %v1113_v9  ;;  %v1157_v14 = vmul.f32 1.442695, %v1114_v41  ;;  %v1199_v9 = vadd.f32 %v2070_v53, %v2068_v40 }
 0x294   : > { %v3063_v32 = vpop.permute.xlu1 %1055 }
 0x295   : > { %2079 = vpow2.f32 %v1155_v10 }
 0x296   : > { %2081 = vpow2.f32 %v1157_v14  ;;  %v1415_v14 = vld [vmem:[#allocation4 + $0x10] sm:$0xff] }
 0x297   : > { %2083 = vpow2.f32 %v1187_v11  ;;  %v1417_v11 = vld [vmem:[#allocation4 + $0x20] sm:$0xff] }
 0x298   : > { %v3068_v42 = vpop.permute.xlu1 %1095 }
 0x29c   : > { %v1061_v30 = vpop.permute.xlu1 %1060 }
 0x29d   : > { %v1117_v15 = vsub.f32 %v2758_v44, %v1061_v30  ;;  %v1118_v49 = vsub.f32 %v2770_v54, %v1061_v30 }
 0x29f   : > { %v1163_v41 = vmul.f32 1.442695, %v1117_v15 }
 0x2a0   : > { %v1368_v3 = vpop.permute.xlu1 %1367 }
 0x2a1   : > { %vm1403_vm9 = vcmp.eq.s32.totalorder %v2969_v59, %v1368_v3  ;;  %vm1404_vm10 = vcmp.eq.s32.totalorder %v2974_v2, %v1368_v3  ;;  %v1189_v3 = vmul.f32 1.442695, %v1130_v4 }
 0x2a2   : > { %v1451_v43 = vsel %vm1403_vm9, %v2673_v45, 0.0  ;;  %v1452_v48 = vsel %vm1404_vm10, %v2683_v50, 0.0 }
 0x2a3   : > { %v1494_v57 = vadd.f32 %v1452_v48, %v1451_v43  ;;  %2085 = vpow2.f32 %v1189_v3  ;;  %v1229_v48 = vadd.f32 %v2074_v52, %v2072_v37 }
 0x2a4   : > { %v1374_v5 = vpop.permute.xlu1 %1373  ;;  %2087 = vpow2.f32 %v1163_v41  ;;  %v1119_v41 = vsub.f32 %v2619_v12, %v3053_v21  ;;  %v1121_v12 = vsub.f32 %v2631_v20, %v3070_v56  ;;  %v1108_v20 = vsub.f32 %v2664_v39, %v3057_v22 }
 0x2a5   : > { %vm1407_vm11 = vcmp.eq.s32.totalorder %v2969_v59, %v1374_v5  ;;  %vm1408_vm12 = vcmp.eq.s32.totalorder %v2974_v2, %v1374_v5  ;;  %1495 = vadd.xlane.f32.xlu1 %v1494_v57 }
 0x2a6   : > { %v1455_v13 = vsel %vm1407_vm11, %v2717_v6, 0.0  ;;  %v1456_v51 = vsel %vm1408_vm12, %v2727_v17, 0.0  ;;  %v2076_v6 = vpop.eup %2075  ;;  %v1165_v17 = vmul.f32 1.442695, %v1118_v49 }
 0x2a7   : > { %v1500_v18 = vadd.f32 %v1456_v51, %v1455_v13  ;;  %v2078_v43 = vpop.eup %2077 }
 0x2a8   : > { %2089 = vpow2.f32 %v1165_v17  ;;  %v2080_v44 = vpop.eup %2079  ;;  %v1208_v57 = vadd.f32 %v2078_v43, %v2076_v6  ;;  %v1120_v17 = vsub.f32 %v2625_v16, %v3053_v21  ;;  %v1421_v43 = vld [vmem:[#allocation4 + $0x40] sm:$0xff]  ;;  %v1122_v16 = vsub.f32 %v2641_v26, %v3070_v56 }
 0x2a9   : > { %1501 = vadd.xlane.f32.xlu1 %v1500_v18  ;;  %v2082_v5 = vpop.eup %2081  ;;  %v1125_v56 = vsub.f32 %v2673_v45, %v3074_v27  ;;  %v1112_v45 = vsub.f32 %v2708_v63, %v3059_v33  ;;  %v1127_v63 = vsub.f32 %v2705_v61, %v3061_v0 }
 0x2aa   : > { %v2084_v30 = vpop.eup %2083  ;;  %v1214_v4 = vadd.f32 %v2082_v5, %v2080_v44  ;;  %v1167_v44 = vmul.f32 1.442695, %v1119_v41  ;;  %v1169_v5 = vmul.f32 1.442695, %v1120_v17 }
 0x2ac   : > { %2091 = vpow2.f32 %v1167_v44 }
 0x2ad   : > { %1200 = vadd.xlane.f32.xlu1 %v1199_v9  ;;  %v2086_v13 = vpop.eup %2085  ;;  %v1419_v9 = vld [vmem:[#allocation4 + $0x30] sm:$0xff]  ;;  %2093 = vpow2.f32 %v1169_v5 }
 0x2ae   : > { %v2088_v18 = vpop.eup %2087  ;;  %v1238_v53 = vadd.f32 %v2086_v13, %v2084_v30  ;;  %v1173_v13 = vmul.f32 1.442695, %v1122_v16  ;;  %v1115_v16 = vsub.f32 %v2746_v31, %v3063_v32  ;;  %v1131_v31 = vsub.f32 %v2752_v36, %v3068_v42 }
 0x2b1   : > { %1230 = vadd.xlane.f32.xlu1 %v1229_v48 }
 0x2b2   : > { %v2090_v15 = vpop.eup %2089 }
 0x2b3   : > { %v1220_v49 = vadd.f32 %v2090_v15, %v2088_v18 }
 0x2b5   : > { %1209 = vadd.xlane.f32.xlu1 %v1208_v57  ;;  %v1463_v10 = vpop.xlane.xlu0 %1462  ;;  %v1105_v57 = vsub.f32 %v2628_v19, %v3055_v62 }
 0x2b6   : > { %v1509_v54 = vadd.f32 %v1463_v10, %v1413_v23  ;;  %v1106_v10 = vsub.f32 %v2638_v25, %v3055_v62  ;;  %v1107_v25 = vsub.f32 %v2656_v34, %v3057_v22  ;;  %v2092_v39 = vpop.eup %2091  ;;  %v1111_v22 = vsub.f32 %v2700_v58, %v3059_v33 }
 0x2b7   : > { %v1139_v30 = vmul.f32 1.442695, %v1105_v57  ;;  %v1153_v58 = vmul.f32 1.442695, %v1112_v45  ;;  %v1128_v57 = vsub.f32 %v2711_v1, %v3061_v0 }
 0x2b8   : > { %1525 = vst.msk [vmem:[#allocation4] sm:$0xff] %vm1263_vm1, %v1509_v54  ;;  %v1423_v54 = vld [vmem:[#allocation4 + $0x50] sm:$0xff]  ;;  %v1141_v19 = vmul.f32 1.442695, %v1106_v10  ;;  %v1143_v62 = vmul.f32 1.442695, %v1107_v25 }
 0x2b9   : > { %1215 = vadd.xlane.f32.xlu1 %v1214_v4  ;;  %v1469_v51 = vpop.xlane.xlu0 %1468  ;;  %2095 = vpow2.f32 %v1139_v30  ;;  %v1185_v30 = vmul.f32 1.442695, %v1128_v57  ;;  %v1159_v25 = vmul.f32 1.442695, %v1115_v16  ;;  %v3414_v16 = vld [vmem:[#allocation30_spill] sm:$0xff] }
 0x2ba   : > { %v1511_v40 = vadd.f32 %v1469_v51, %v1415_v14  ;;  %v1171_v14 = vmul.f32 1.442695, %v1121_v12  ;;  %2097 = vpow2.f32 %v1141_v19  ;;  %v1145_v51 = vmul.f32 1.442695, %v1108_v20  ;;  %v1418_v19 = vld [vmem:[#allocation4 + $0x28] sm:$0xff] }
 0x2bc   : > { %1527 = vst.msk [vmem:[#allocation4 + $0x10] sm:$0xff] %vm1263_vm1, %v1511_v40  ;;  %2099 = vpow2.f32 %v1171_v14  ;;  %v1126_v40 = vsub.f32 %v2683_v50, %v3074_v27 }
 0x2bd   : > { %1239 = vadd.xlane.f32.xlu1 %v1238_v53  ;;  %v1475_v37 = vpop.xlane.xlu0 %1474  ;;  %2101 = vpow2.f32 %v1173_v13 }
 0x2be   : > { %v1513_v3 = vadd.f32 %v1475_v37, %v1417_v11  ;;  %v2094_v11 = vpop.eup %2093  ;;  %2103 = vpow2.f32 %v1143_v62  ;;  %v1179_v37 = vmul.f32 1.442695, %v1125_v56  ;;  %v1181_v50 = vmul.f32 1.442695, %v1126_v40  ;;  %v1420_v56 = vld [vmem:[#allocation4 + $0x38] sm:$0xff] }
 0x2bf   : > { %2105 = vpow2.f32 %v1145_v51 }
 0x2c0   : > { %1529 = vst.msk [vmem:[#allocation4 + $0x20] sm:$0xff] %vm1263_vm1, %v1513_v3  ;;  %v3127_v3 = vpop.permute.xlu1 %1379  ;;  %2107 = vpow2.f32 %v1179_v37 }
 0x2c1   : > { %1221 = vadd.xlane.f32.xlu1 %v1220_v49  ;;  %v1481_v52 = vpop.xlane.xlu0 %1480  ;;  %v1151_v49 = vmul.f32 1.442695, %v1111_v22  ;;  %2109 = vpow2.f32 %v1181_v50  ;;  %vm1411_vm15 = vcmp.eq.s32.totalorder %v2969_v59, %v3127_v3  ;;  %vm1412_vm0 = vcmp.eq.s32.totalorder %v2974_v2, %v3127_v3 }
 0x2c2   : > { %v1515_v6 = vadd.f32 %v1481_v52, %v1419_v9  ;;  %v1414_v9 = vld [vmem:[#allocation4 + $0x8] sm:$0xff]  ;;  %v1223_v52 = vadd.f32 %v2094_v11, %v2092_v39 }
 0x2c3   : > { %v2096_v27 = vpop.eup %2095  ;;  %2111 = vpow2.f32 %v1151_v49 }
 0x2c4   : > { %1531 = vst.msk [vmem:[#allocation4 + $0x30] sm:$0xff] %vm1263_vm1, %v1515_v6  ;;  %v2098_v41 = vpop.eup %2097  ;;  %2113 = vpow2.f32 %v1153_v58 }
 0x2c5   : > { %v1487_v48 = vpop.xlane.xlu0 %1486  ;;  %v1202_v12 = vadd.f32 %v2098_v41, %v2096_v27  ;;  %v1460_v41 = vsel %vm1412_vm0, %v2775_v7, 0.0 }
 0x2c6   : > { %v1517_v23 = vadd.f32 %v1487_v48, %v1421_v43  ;;  %v2100_v17 = vpop.eup %2099 }
 0x2c7   : > { %v2102_v44 = vpop.eup %2101 }
 0x2c8   : > { %1533 = vst.msk [vmem:[#allocation4 + $0x40] sm:$0xff] %vm1263_vm1, %v1517_v23  ;;  %v1226_v14 = vadd.f32 %v2102_v44, %v2100_v17 }
 0x2c9   : > { %v1493_v21 = vpop.xlane.xlu0 %1492 }
 0x2ca   : > { %v1519_v4 = vadd.f32 %v1493_v21, %v1423_v54  ;;  %v1416_v54 = vld [vmem:[#allocation4 + $0x18] sm:$0xff] }
 0x2cc   : > { %1535 = vst.msk [vmem:[#allocation4 + $0x50] sm:$0xff] %vm1263_vm1, %v1519_v4  ;;  %v2104_v4 = vpop.eup %2103 }
 0x2cd   : > { %v2106_v13 = vpop.eup %2105 }
 0x2ce   : > { %v2108_v62 = vpop.eup %2107  ;;  %v1205_v51 = vadd.f32 %v2106_v13, %v2104_v4 }
 0x2cf   : > { %v2110_v40 = vpop.eup %2109 }
 0x2d0   : > { %v1232_v37 = vadd.f32 %v2110_v40, %v2108_v62 }
 0x2d1   : > { %v1371_v26 = vpop.permute.xlu0 %1370 }
 0x2d2   : > { %vm1405_vm13 = vcmp.eq.s32.totalorder %v2969_v59, %v1371_v26  ;;  %vm1406_vm14 = vcmp.eq.s32.totalorder %v2974_v2, %v1371_v26 }
 0x2d3   : > { %v1453_v34 = vsel %vm1405_vm13, %v2705_v61, 0.0  ;;  %v1454_v18 = vsel %vm1406_vm14, %v2711_v1, 0.0  ;;  %v1183_v61 = vmul.f32 1.442695, %v1127_v63  ;;  %v1116_v1 = vsub.f32 %v2749_v35, %v3063_v32 }
 0x2d4   : > { %v1497_v53 = vadd.f32 %v1454_v18, %v1453_v34  ;;  %v1132_v35 = vsub.f32 %v2755_v38, %v3068_v42  ;;  %v2112_v34 = vpop.eup %2111  ;;  %v1191_v18 = vmul.f32 1.442695, %v1131_v31  ;;  %v1422_v42 = vld [vmem:[#allocation4 + $0x48] sm:$0xff]  ;;  %v3419_v31 = vld [vmem:[#allocation38_spill] sm:$0xff] }
 0x2d5   : > { %v3125_v15 = vpop.permute.xlu0 %1376  ;;  %v1161_v26 = vmul.f32 1.442695, %v1116_v1  ;;  %v2114_v22 = vpop.eup %2113 }
 0x2d6   : > { %1498 = vadd.xlane.f32.xlu0 %v1497_v53  ;;  %v1193_v53 = vmul.f32 1.442695, %v1132_v35  ;;  %vm1409_vm2 = vcmp.eq.s32.totalorder %v2969_v59, %v3125_v15  ;;  %vm1410_vm3 = vcmp.eq.s32.totalorder %v2974_v2, %v3125_v15  ;;  %v3412_v59 = vsub.f32 %v2855_v28, %v2870_v55  ;;  %v991_v55 = vld [vmem:[#allocation3] sm:$0xff] }
 0x2d7   : > { %v3413_v2 = vsub.f32 %v2853_v8, %v2867_v46  ;;  %v3417_v46 = vld [vmem:[#allocation35_spill] sm:$0xff] }
 0x2d9   : > { %v1101_v6 = vpop.permute.xlu0 %1100  ;;  %v965_v15 = vmul.f32 1.442695, %v3413_v2 }
 0x2da   : > { %v1133_v33 = vsub.f32 %v2761_v47, %v1101_v6  ;;  %v1134_v43 = vsub.f32 %v2775_v7, %v1101_v6  ;;  %v1466_v48 = vpop.xlane.xlu1 %1465  ;;  %1224 = vadd.xlane.f32.xlu0 %v1223_v52  ;;  %v1459_v52 = vsel %vm1411_vm15, %v2761_v47, 0.0  ;;  %v1211_v6 = vadd.f32 %v2114_v22, %v2112_v34  ;;  %v996_v22 = vld [vmem:[#allocation3 + $0x28] sm:$0xff] }
 0x2db   : > { %v1510_v23 = vadd.f32 %v1466_v48, %v1414_v9  ;;  %v1506_v3 = vadd.f32 %v1460_v41, %v1459_v52  ;;  %v1457_v7 = vsel %vm1409_vm2, %v2752_v36, 0.0  ;;  %v1424_v36 = vld [vmem:[#allocation4 + $0x58] sm:$0xff] }
 0x2dc   : > { %v1195_v5 = vmul.f32 1.442695, %v1133_v33  ;;  %v1197_v10 = vmul.f32 1.442695, %v1134_v43  ;;  %v998_v52 = vld [vmem:[#allocation3 + $0x38] sm:$0xff] }
 0x2dd   : > { %1526 = vst.msk [vmem:[#allocation4 + $0x8] sm:$0xff] %vm1263_vm1, %v1510_v23  ;;  %v1458_v23 = vsel %vm1410_vm3, %v2755_v38, 0.0 }
 0x2de   : > { %2115 = vpow2.f32 %v1195_v5  ;;  %v1472_v21 = vpop.xlane.xlu1 %1471  ;;  %1203 = vadd.xlane.f32.xlu0 %v1202_v12  ;;  %v1503_v5 = vadd.f32 %v1458_v23, %v1457_v7  ;;  %v979_v12 = vmul.f32 1.442695, %v3412_v59  ;;  %v3428_v7 = vld [vmem:[#allocation18_spill] sm:$0xff]  ;;  %v3429_v23 = vld [vmem:[#allocation19_spill] sm:$0xff]  ;;  %v3432_v59 = vld [vmem:[#allocation24_spill] sm:$0xff] }
 0x2df   : > { %2117 = vpow2.f32 %v1197_v10  ;;  %v1512_v0 = vadd.f32 %v1472_v21, %v1416_v54  ;;  %v3411_v10 = vsub.f32 %v2813_v24, %v2818_v29  ;;  %v3415_v21 = vsub.f32 %v3414_v16, %v2906_v60  ;;  %v1426_v24 = vld [vmem:[#allocation4 + $0x68] sm:$0xff] }
 0x2e0   : > { %2119 = vpow2.f32 %v1183_v61 }
 0x2e1   : > { %1528 = vst.msk [vmem:[#allocation4 + $0x18] sm:$0xff] %vm1263_vm1, %v1512_v0  ;;  %2121 = vpow2.f32 %v1185_v30  ;;  %v959_v54 = vmul.f32 1.442695, %v3411_v10  ;;  %v969_v30 = vmul.f32 1.442695, %v3415_v21  ;;  %v3416_v0 = vld [vmem:[#allocation33_spill] sm:$0xff] }
 0x2e2   : > { %v1478_v20 = vpop.xlane.xlu1 %1477  ;;  %1227 = vadd.xlane.f32.xlu0 %v1226_v14  ;;  %2123 = vpow2.f32 %v1159_v25  ;;  %v3418_v8 = vsub.f32 %v3416_v0, %v3417_v46  ;;  %v1001_v25 = vld [vmem:[#allocation3 + $0x50] sm:$0xff] }
 0x2e3   : > { %v1514_v32 = vadd.f32 %v1478_v20, %v1418_v19  ;;  %2125 = vpow2.f32 %v1161_v26  ;;  %v3420_v20 = vld [vmem:[#allocation40_spill] sm:$0xff] }
 0x2e4   : > { %2127 = vpow2.f32 %v1191_v18  ;;  %v985_v4 = vmul.f32 1.442695, %v3418_v8  ;;  %v3421_v26 = vsub.f32 %v3419_v31, %v3420_v20 }
 0x2e5   : > { %1530 = vst.msk [vmem:[#allocation4 + $0x28] sm:$0xff] %vm1263_vm1, %v1514_v32  ;;  %2129 = vpow2.f32 %v1193_v53 }
 0x2e6   : > { %v1484_v39 = vpop.xlane.xlu1 %1483  ;;  %1206 = vadd.xlane.f32.xlu0 %v1205_v51  ;;  %2131 = vpow2.f32 %v959_v54  ;;  %v973_v35 = vmul.f32 1.442695, %v3421_v26  ;;  %v994_v51 = vld [vmem:[#allocation3 + $0x18] sm:$0xff]  ;;  %v3431_v54 = vld [vmem:[#allocation22_spill] sm:$0xff] }
 0x2e7   : > { %v1516_v11 = vadd.f32 %v1484_v39, %v1420_v56  ;;  %2133 = vpow2.f32 %v979_v12  ;;  %v3433_v12 = vsub.f32 %v3431_v54, %v3432_v59 }
 0x2e8   : > { %v2116_v45 = vpop.eup %2115  ;;  %2135 = vpow2.f32 %v965_v15  ;;  %v1425_v15 = vld [vmem:[#allocation4 + $0x60] sm:$0xff] }
 0x2e9   : > { %v2118_v50 = vpop.eup %2117  ;;  %1532 = vst.msk [vmem:[#allocation4 + $0x38] sm:$0xff] %vm1263_vm1, %v1516_v11  ;;  %2137 = vpow2.f32 %v969_v30  ;;  %v963_v2 = vmul.f32 1.442695, %v3433_v12  ;;  %v999_v30 = vld [vmem:[#allocation3 + $0x40] sm:$0xff]  ;;  %v1428_v12 = vld [vmem:[#allocation4 + $0x78] sm:$0xff] }
 0x2ea   : > { %v1490_v27 = vpop.xlane.xlu1 %1489  ;;  %1233 = vadd.xlane.f32.xlu0 %v1232_v37  ;;  %v1244_v49 = vadd.f32 %v2118_v50, %v2116_v45  ;;  %v2120_v58 = vpop.eup %2119  ;;  %2139 = vpow2.f32 %v985_v4  ;;  %v1004_v37 = vld [vmem:[#allocation3 + $0x68] sm:$0xff] }
 0x2eb   : > { %v1518_v9 = vadd.f32 %v1490_v27, %v1422_v42  ;;  %v2122_v17 = vpop.eup %2121  ;;  %2141 = vpow2.f32 %v973_v35 }
 0x2ec   : > { %1245 = vadd.xlane.f32.xlu1 %v1244_v49  ;;  %v2124_v63 = vpop.eup %2123  ;;  %v1235_v33 = vadd.f32 %v2122_v17, %v2120_v58 }
 0x2ed   : > { %1534 = vst.msk [vmem:[#allocation4 + $0x48] sm:$0xff] %vm1263_vm1, %v1518_v9  ;;  %v2126_v43 = vpop.eup %2125 }
 0x2ee   : > { %1212 = vadd.xlane.f32.xlu0 %v1211_v6  ;;  %v2128_v48 = vpop.eup %2127  ;;  %v1217_v44 = vadd.f32 %v2126_v43, %v2124_v63  ;;  %v3423_v63 = vld [vmem:[#allocation21_spill] sm:$0xff] }
 0x2ef   : > { %v2130_v57 = vpop.eup %2129 }
 0x2f0   : > { %1507 = vadd.xlane.f32.xlu1 %v1506_v3  ;;  %v1241_v47 = vadd.f32 %v2130_v57, %v2128_v48  ;;  %v2132_v29 = vpop.eup %2131  ;;  %v3422_v3 = vld [vmem:[#allocation20_spill] sm:$0xff]  ;;  %v3425_v48 = vld [vmem:[#allocation23_spill] sm:$0xff] }
 0x2f1   : > { %v1007_v19 = vmul.f32 %v2132_v29, %v991_v55  ;;  %v2134_v14 = vpop.eup %2133  ;;  %v3436_v29 = vld [vmem:[#allocation26_spill] sm:$0xff] }
 0x2f2   : > { %1236 = vadd.xlane.f32.xlu0 %v1235_v33  ;;  %v1017_v32 = vmul.f32 %v2134_v14, %v1001_v25  ;;  %v2136_v62 = vpop.eup %2135  ;;  %v3424_v33 = vsub.f32 %v3422_v3, %v3423_v63  ;;  %v3440_v25 = vld [vmem:[#allocation29_spill] sm:$0xff] }
 0x2f3   : > { %v1010_v34 = vmul.f32 %v2136_v62, %v994_v51  ;;  %v2138_v18 = vpop.eup %2137  ;;  %v3443_v51 = vld [vmem:[#allocation32_spill] sm:$0xff] }
 0x2f4   : > { %v1012_v11 = vmul.f32 %v2138_v18, %v996_v22  ;;  %v2140_v45 = vpop.eup %2139  ;;  %v975_v43 = vmul.f32 1.442695, %v3424_v33  ;;  %v1006_v33 = vld [vmem:[#allocation3 + $0x78] sm:$0xff] }
 0x2f5   : > { %v1020_v27 = vmul.f32 %v2140_v45, %v1004_v37  ;;  %v2142_v49 = vpop.eup %2141  ;;  %v3445_v45 = vld [vmem:[#allocation34_spill] sm:$0xff] }
 0x2f6   : > { %1218 = vadd.xlane.f32.xlu0 %v1217_v44  ;;  %v1014_v58 = vmul.f32 %v2142_v49, %v998_v52  ;;  %2143 = vpow2.f32 %v975_v43  ;;  %v3426_v44 = vld [vmem:[#allocation25_spill] sm:$0xff] }
 0x2f7   : > { %v3427_v57 = vsub.f32 %v3425_v48, %v3426_v44  ;;  %v1002_v52 = vld [vmem:[#allocation3 + $0x58] sm:$0xff] }
 0x2fa   : > { %1242 = vadd.xlane.f32.xlu0 %v1241_v47  ;;  %v961_v47 = vmul.f32 1.442695, %v3427_v57  ;;  %v995_v57 = vld [vmem:[#allocation3 + $0x20] sm:$0xff] }
 0x2fc   : > { %2145 = vpow2.f32 %v961_v47 }
 0x2fe   : > { %1504 = vadd.xlane.f32.xlu0 %v1503_v5  ;;  %v3430_v5 = vsub.f32 %v3428_v7, %v3429_v23 }
 0x300   : > { %v977_v10 = vmul.f32 1.442695, %v3430_v5 }
 0x302   : > { %2147 = vpow2.f32 %v977_v10 }
 0x303   : > { %2149 = vpow2.f32 %v963_v2  ;;  %v1003_v2 = vld [vmem:[#allocation3 + $0x60] sm:$0xff] }
 0x332   : > { %v1496_v61 = vpop.xlane.xlu1 %1495 }
 0x333   : > { %v1520_v38 = vadd.f32 %v1496_v61, %v1424_v36  ;;  %v2144_v36 = vpop.eup %2143  ;;  %v3434_v61 = vld [vmem:[#allocation42_spill] sm:$0xff] }
 0x334   : > { %v1015_v0 = vmul.f32 %v2144_v36, %v999_v30  ;;  %v2146_v46 = vpop.eup %2145  ;;  %v997_v30 = vld [vmem:[#allocation3 + $0x30] sm:$0xff] }
 0x335   : > { %1536 = vst.msk [vmem:[#allocation4 + $0x58] sm:$0xff] %vm1263_vm1, %v1520_v38  ;;  %v3435_v38 = vld [vmem:[#allocation41_spill] sm:$0xff]  ;;  %v2148_v26 = vpop.eup %2147 }
 0x336   : > { %v1502_v1 = vpop.xlane.xlu1 %1501  ;;  %v958_v16 = vsub.f32 %v3435_v38, %v3434_v61 }
 0x337   : > { %v1522_v28 = vadd.f32 %v1502_v1, %v1426_v24  ;;  %v3437_v1 = vld [vmem:[#allocation28_spill] sm:$0xff] }
 0x338   : > { %v3438_v55 = vsub.f32 %v3436_v29, %v3437_v1  ;;  %v989_v8 = vmul.f32 1.442695, %v958_v16 }
 0x339   : > { %1538 = vst.msk [vmem:[#allocation4 + $0x68] sm:$0xff] %vm1263_vm1, %v1522_v28 }
 0x33a   : > { %v1201_v13 = vpop.xlane.xlu1 %1200  ;;  %v981_v28 = vmul.f32 1.442695, %v3438_v55 }
 0x33b   : > { %v1247_v60 = vadd.f32 %v1201_v13, %v1007_v19  ;;  %v992_v19 = vld [vmem:[#allocation3 + $0x8] sm:$0xff] }
 0x33c   : > { %2151 = vpow2.f32 %v981_v28  ;;  %v3439_v13 = vld [vmem:[#allocation27_spill] sm:$0xff]  ;;  %v1008_v20 = vmul.f32 %v2146_v46, %v992_v19  ;;  %v1005_v28 = vld [vmem:[#allocation3 + $0x70] sm:$0xff] }
 0x33d   : > { %1264 = vst.msk [vmem:[#allocation3] sm:$0xff] %vm1263_vm1, %v1247_v60  ;;  %v3441_v60 = vsub.f32 %v3439_v13, %v3440_v25  ;;  %2153 = vpow2.f32 %v989_v8  ;;  %v1427_v19 = vld [vmem:[#allocation4 + $0x70] sm:$0xff] }
 0x33e   : > { %v1231_v56 = vpop.xlane.xlu1 %1230 }
 0x33f   : > { %v1257_v40 = vadd.f32 %v1231_v56, %v1017_v32  ;;  %v967_v31 = vmul.f32 1.442695, %v3441_v60  ;;  %v1000_v32 = vld [vmem:[#allocation3 + $0x48] sm:$0xff] }
 0x340   : > { %v3442_v56 = vld [vmem:[#allocation31_spill] sm:$0xff]  ;;  %v1016_v18 = vmul.f32 %v2148_v26, %v1000_v32 }
 0x341   : > { %1274 = vst.msk [vmem:[#allocation3 + $0x50] sm:$0xff] %vm1263_vm1, %v1257_v40  ;;  %2155 = vpow2.f32 %v967_v31  ;;  %v3444_v40 = vsub.f32 %v3442_v56, %v3443_v51 }
 0x342   : > { %v1210_v39 = vpop.xlane.xlu1 %1209 }
 0x343   : > { %v1250_v53 = vadd.f32 %v1210_v39, %v1010_v34  ;;  %v983_v34 = vmul.f32 1.442695, %v3444_v40  ;;  %v2150_v39 = vpop.eup %2149 }
 0x344   : > { %v1561_v25 = vld [vmem:[#allocation3] sm:$0xff] (!%p1898_p6) }
 0x345   : > { %1267 = vst.msk [vmem:[#allocation3 + $0x18] sm:$0xff] %vm1263_vm1, %v1250_v53  ;;  %v993_v53 = vld [vmem:[#allocation3 + $0x10] sm:$0xff]  ;;  %2157 = vpow2.f32 %v983_v34 }
 0x346   : > { %v1216_v42 = vpop.xlane.xlu1 %1215  ;;  %v2152_v49 = vpop.eup %2151 }
 0x347   : > { %v1252_v50 = vadd.f32 %v1216_v42, %v1012_v11  ;;  %v3446_v42 = vld [vmem:[#allocation36_spill] sm:$0xff]  ;;  %v1018_v43 = vmul.f32 %v2152_v49, %v1002_v52 }
 0x348   : > { %v3447_v37 = vsub.f32 %v3445_v45, %v3446_v42  ;;  %v1571_v40 = vld [vmem:[#allocation3 + $0x50] sm:$0xff] (!%p1898_p6) }
 0x349   : > { %1269 = vst.msk [vmem:[#allocation3 + $0x28] sm:$0xff] %vm1263_vm1, %v1252_v50 }
 0x34a   : > { %v1240_v9 = vpop.xlane.xlu1 %1239  ;;  %v971_v50 = vmul.f32 1.442695, %v3447_v37  ;;  %v1625_v37 = vld [vmem:[#allocation4] sm:$0xff] (!%p1898_p6) }
 0x34b   : > { %v1260_v41 = vadd.f32 %v1240_v9, %v1020_v27  ;;  %v1009_v27 = vmul.f32 %v2150_v39, %v993_v53 }
 0x34c   : > { %2159 = vpow2.f32 %v971_v50 }
 0x34d   : > { %1277 = vst.msk [vmem:[#allocation3 + $0x68] sm:$0xff] %vm1263_vm1, %v1260_v41 }
 0x34e   : > { %v1222_v6 = vpop.xlane.xlu1 %1221 }
 0x34f   : > { %v1254_v17 = vadd.f32 %v1222_v6, %v1014_v58  ;;  %v2154_v58 = vpop.eup %2153  ;;  %v3448_v6 = vld [vmem:[#allocation37_spill] sm:$0xff] }
 0x350   : > { %v2156_v48 = vpop.eup %2155  ;;  %v1022_v7 = vmul.f32 %v2154_v58, %v1006_v33  ;;  %v1627_v33 = vld [vmem:[#allocation4 + $0x10] sm:$0xff] (!%p1898_p6) }
 0x351   : > { %1271 = vst.msk [vmem:[#allocation3 + $0x38] sm:$0xff] %vm1263_vm1, %v1254_v17  ;;  %v3449_v17 = vld [vmem:[#allocation39_spill] sm:$0xff]  ;;  %v1011_v10 = vmul.f32 %v2156_v48, %v995_v57  ;;  %v2158_v54 = vpop.eup %2157  ;;  %v1549_v48 = vld [vmem:[#allocation2 + $0x20] sm:$0xff] (!%p1898_p6) }
 0x352   : > { %v3450_v3 = vsub.f32 %v3448_v6, %v3449_v17  ;;  %v1019_v38 = vmul.f32 %v2158_v54, %v1003_v2  ;;  %v1548_v6 = vld [vmem:[#allocation2 + $0x18] sm:$0xff] (!%p1898_p6)  ;;  %v1629_v2 = vld [vmem:[#allocation4 + $0x20] sm:$0xff] (!%p1898_p6) }
 0x354   : > { %v987_v63 = vmul.f32 1.442695, %v3450_v3  ;;  %v1574_v49 = vld [vmem:[#allocation3 + $0x68] sm:$0xff] (!%p1898_p6) }
 0x356   : > { %2161 = vpow2.f32 %v987_v63  ;;  %v2160_v16 = vpop.eup %2159 }
 0x357   : > { %v1013_v29 = vmul.f32 %v2160_v16, %v997_v30  ;;  %2163 = vlog2.f32 (!%p1898_p6), %v1561_v25  ;;  %v1554_v25 = vld [vmem:[#allocation2 + $0x48] sm:$0xff] (!%p1898_p6) }
 0x360   : > { %v2162_v1 = vpop.eup %2161 }
 0x361   : > { %v1021_v46 = vmul.f32 %v2162_v1, %v1005_v28  ;;  %v2164_v34 = vpop.eup (!%p1898_p6), %2163  ;;  %v1631_v28 = vld [vmem:[#allocation4 + $0x30] sm:$0xff] (!%p1898_p6) }
 0x362   : > { %v1578_v53 = vmul.f32 (!%p1898_p6), 0.6931472, %v2164_v34 }
 0x363   : > { %v1499_v21 = vpop.xlane.xlu0 %1498 }
 0x364   : > { %v1521_v24 = vadd.f32 %v1499_v21, %v1425_v15 }
 0x366   : > { %1537 = vst.msk [vmem:[#allocation4 + $0x60] sm:$0xff] %vm1263_vm1, %v1521_v24 }
 0x367   : > { %v1225_v4 = vpop.xlane.xlu0 %1224 }
 0x368   : > { %v1255_v14 = vadd.f32 %v1225_v4, %v1015_v0 }
 0x36a   : > { %1272 = vst.msk [vmem:[#allocation3 + $0x40] sm:$0xff] %vm1263_vm1, %v1255_v14 }
 0x36b   : > { %v1204_v35 = vpop.xlane.xlu0 %1203 }
 0x36c   : > { %v1248_v62 = vadd.f32 %v1204_v35, %v1008_v20  ;;  %v1564_v20 = vld [vmem:[#allocation3 + $0x18] sm:$0xff] (!%p1898_p6)  ;;  %v1566_v35 = vld [vmem:[#allocation3 + $0x28] sm:$0xff] (!%p1898_p6) }
 0x36e   : > { %1265 = vst.msk [vmem:[#allocation3 + $0x8] sm:$0xff] %vm1263_vm1, %v1248_v62  ;;  %v1568_v62 = vld [vmem:[#allocation3 + $0x38] sm:$0xff] (!%p1898_p6) }
 0x36f   : > { %v1228_v22 = vpop.xlane.xlu0 %1227 }
 0x370   : > { %v1256_v11 = vadd.f32 %v1228_v22, %v1016_v18  ;;  %v1545_v18 = vld [vmem:[#allocation2] sm:$0xff] (!%p1898_p6) }
 0x371   : > { %v1569_v56 = vld [vmem:[#allocation3 + $0x40] sm:$0xff] (!%p1898_p6)  ;;  %v1609_v52 = vadd.f32 (!%p1898_p6), %v1578_v53, %v1545_v18  ;;  %v1556_v18 = vld [vmem:[#allocation2 + $0x58] sm:$0xff] (!%p1898_p6) }
 0x372   : > { %1273 = vst.msk [vmem:[#allocation3 + $0x48] sm:$0xff] %vm1263_vm1, %v1256_v11  ;;  %v1546_v11 = vld [vmem:[#allocation2 + $0x8] sm:$0xff] (!%p1898_p6) }
 0x373   : > { %v1207_v9 = vpop.xlane.xlu0 %1206 }
 0x374   : > { %v1249_v41 = vadd.f32 %v1207_v9, %v1009_v27  ;;  %v1547_v27 = vld [vmem:[#allocation2 + $0x10] sm:$0xff] (!%p1898_p6) }
 0x375   : > { %v1562_v60 = vld [vmem:[#allocation3 + $0x8] sm:$0xff] (!%p1898_p6) }
 0x376   : > { %1266 = vst.msk [vmem:[#allocation3 + $0x10] sm:$0xff] %vm1263_vm1, %v1249_v41  ;;  %2165 = vlog2.f32 (!%p1898_p6), %v1562_v60  ;;  %v1626_v41 = vld [vmem:[#allocation4 + $0x8] sm:$0xff] (!%p1898_p6) }
 0x377   : > { %v1234_v44 = vpop.xlane.xlu0 %1233 }
 0x378   : > { %v1258_v47 = vadd.f32 %v1234_v44, %v1018_v43 }
 0x379   : > { %v1246_v23 = vpop.xlane.xlu1 %1245  ;;  %v1570_v51 = vld [vmem:[#allocation3 + $0x48] sm:$0xff] (!%p1898_p6) }
 0x37a   : > { %1275 = vst.msk [vmem:[#allocation3 + $0x58] sm:$0xff] %vm1263_vm1, %v1258_v47  ;;  %v1262_v5 = vadd.f32 %v1246_v23, %v1022_v7  ;;  %v1641_v47 = vsub.f32 (!%p1898_p6), %v1609_v52, %v1625_v37  ;;  %v1628_v23 = vld [vmem:[#allocation4 + $0x18] sm:$0xff] (!%p1898_p6)  ;;  %v1558_v52 = vld [vmem:[#allocation2 + $0x68] sm:$0xff] (!%p1898_p6) }
 0x37b   : > { %v1213_v59 = vpop.xlane.xlu0 %1212 }
 0x37c   : > { %1279 = vst.msk [vmem:[#allocation3 + $0x78] sm:$0xff] %vm1263_vm1, %v1262_v5  ;;  %v1251_v15 = vadd.f32 %v1213_v59, %v1011_v10  ;;  %v1550_v10 = vld [vmem:[#allocation2 + $0x28] sm:$0xff] (!%p1898_p6)  ;;  %1657 = vst.msk [vmem:[%s2491_s20] sm:$0xff] (!%p1898_p6), %vm1263_vm1, %v1641_v47  ;;  %v1560_v47 = vld [vmem:[#allocation2 + $0x78] sm:$0xff] (!%p1898_p6) }
 0x37d   : > { %v1508_v36 = vpop.xlane.xlu1 %1507  ;;  %v1563_v31 = vld [vmem:[#allocation3 + $0x10] sm:$0xff] (!%p1898_p6) }
 0x37e   : > { %1268 = vst.msk [vmem:[#allocation3 + $0x20] sm:$0xff] %vm1263_vm1, %v1251_v15  ;;  %v1524_v61 = vadd.f32 %v1508_v36, %v1428_v12  ;;  %2167 = vlog2.f32 (!%p1898_p6), %v1563_v31  ;;  %v1551_v36 = vld [vmem:[#allocation2 + $0x30] sm:$0xff] (!%p1898_p6) }
 0x37f   : > { %v1237_v21 = vpop.xlane.xlu0 %1236  ;;  %2169 = vlog2.f32 (!%p1898_p6), %v1564_v20 }
 0x380   : > { %1540 = vst.msk [vmem:[#allocation4 + $0x78] sm:$0xff] %vm1263_vm1, %v1524_v61  ;;  %v1259_v24 = vadd.f32 %v1237_v21, %v1019_v38  ;;  %v2166_v22 = vpop.eup (!%p1898_p6), %2165  ;;  %v1630_v21 = vld [vmem:[#allocation4 + $0x28] sm:$0xff] (!%p1898_p6) }
 0x381   : > { %v1572_v39 = vld [vmem:[#allocation3 + $0x58] sm:$0xff] (!%p1898_p6)  ;;  %v1580_v50 = vmul.f32 (!%p1898_p6), 0.6931472, %v2166_v22 }
 0x382   : > { %1276 = vst.msk [vmem:[#allocation3 + $0x60] sm:$0xff] %vm1263_vm1, %v1259_v24  ;;  %v1552_v24 = vld [vmem:[#allocation2 + $0x38] sm:$0xff] (!%p1898_p6) }
 0x383   : > { %v1219_v55 = vpop.xlane.xlu0 %1218  ;;  %v1610_v63 = vadd.f32 (!%p1898_p6), %v1580_v50, %v1546_v11  ;;  %v1576_v44 = vld [vmem:[#allocation3 + $0x78] sm:$0xff] (!%p1898_p6)  ;;  %v1635_v11 = vld [vmem:[#allocation4 + $0x50] sm:$0xff] (!%p1898_p6) }
 0x384   : > { %v1253_v0 = vadd.f32 %v1219_v55, %v1013_v29 }
 0x385   : > { %v1565_v26 = vld [vmem:[#allocation3 + $0x20] sm:$0xff] (!%p1898_p6)  ;;  %v1642_v59 = vsub.f32 (!%p1898_p6), %v1610_v63, %v1626_v41  ;;  %v1559_v63 = vld [vmem:[#allocation2 + $0x70] sm:$0xff] (!%p1898_p6) }
 0x386   : > { %1270 = vst.msk [vmem:[#allocation3 + $0x30] sm:$0xff] %vm1263_vm1, %v1253_v0  ;;  %2171 = vlog2.f32 (!%p1898_p6), %v1565_v26  ;;  %v1633_v26 = vld [vmem:[#allocation4 + $0x40] sm:$0xff] (!%p1898_p6) }
 0x387   : > { %v1243_v8 = vpop.xlane.xlu0 %1242  ;;  %2173 = vlog2.f32 (!%p1898_p6), %v1566_v35  ;;  %1658 = vst.msk [vmem:[%s2491_s20 + $0x8] sm:$0xff] (!%p1898_p6), %vm1263_vm1, %v1642_v59 }
 0x388   : > { %v1261_v4 = vadd.f32 %v1243_v8, %v1021_v46  ;;  %1544 = sbr.rel (%p1898_p6) target bundleno = 937 (0x3a9), region = 82  ;;  %v2168_v42 = vpop.eup (!%p1898_p6), %2167  ;;  %v1553_v46 = vld [vmem:[#allocation2 + $0x40] sm:$0xff] (!%p1898_p6) }
 0x389   : > { %v1573_v45 = vld [vmem:[#allocation3 + $0x60] sm:$0xff] (!%p1898_p6)  ;;  %v2170_v9 = vpop.eup (!%p1898_p6), %2169  ;;  %v1582_v58 = vmul.f32 (!%p1898_p6), 0.6931472, %v2168_v42 }
 0x38a   : > { %1278 = vst.msk [vmem:[#allocation3 + $0x70] sm:$0xff] %vm1263_vm1, %v1261_v4  ;;  %v1584_v43 = vmul.f32 (!%p1898_p6), 0.6931472, %v2170_v9  ;;  %v1557_v42 = vld [vmem:[#allocation2 + $0x60] sm:$0xff] (!%p1898_p6) }
 0x38b   : > { %v1505_v14 = vpop.xlane.xlu0 %1504  ;;  %v1611_v7 = vadd.f32 (!%p1898_p6), %v1582_v58, %v1547_v27 }
 0x38c   : > { %v1523_v13 = vadd.f32 %v1505_v14, %v1427_v19  ;;  %v1612_v12 = vadd.f32 (!%p1898_p6), %v1584_v43, %v1548_v6  ;;  %v1632_v14 = vld [vmem:[#allocation4 + $0x38] sm:$0xff] (!%p1898_p6) }
 0x38d   : > { %v1567_v32 = vld [vmem:[#allocation3 + $0x30] sm:$0xff] (!%p1898_p6)  ;;  %v1643_v38 = vsub.f32 (!%p1898_p6), %v1611_v7, %v1627_v33 }
 0x38e   : > { %1539 = vst.msk [vmem:[#allocation4 + $0x70] sm:$0xff] %vm1263_vm1, %v1523_v13  ;;  %2175 = vlog2.f32 (!%p1898_p6), %v1567_v32  ;;  %v1644_v1 = vsub.f32 (!%p1898_p6), %v1612_v12, %v1628_v23  ;;  %v1555_v32 = vld [vmem:[#allocation2 + $0x50] sm:$0xff] (!%p1898_p6)  ;;  %v1640_v12 = vld [vmem:[#allocation4 + $0x78] sm:$0xff] (!%p1898_p6) }
 0x38f   : > { %2177 = vlog2.f32 %v1568_v62  ;;  %1659 = vst.msk [vmem:[%s2491_s20 + $0x10] sm:$0xff] %vm1263_vm1, %v1643_v38 }
 0x390   : > { %2179 = vlog2.f32 %v1569_v56  ;;  %v2172_v3 = vpop.eup %2171  ;;  %1660 = vst.msk [vmem:[%s2491_s20 + $0x18] sm:$0xff] %vm1263_vm1, %v1644_v1 }
 0x391   : > { %2181 = vlog2.f32 %v1570_v51  ;;  %v1575_v17 = vld [vmem:[#allocation3 + $0x70] sm:$0xff]  ;;  %v2174_v57 = vpop.eup %2173  ;;  %v1586_v5 = vmul.f32 0.6931472, %v2172_v3 }
 0x392   : > { %2183 = vlog2.f32 %v1571_v40  ;;  %v1588_v15 = vmul.f32 0.6931472, %v2174_v57  ;;  %v1634_v40 = vld [vmem:[#allocation4 + $0x48] sm:$0xff] }
 0x393   : > { %2185 = vlog2.f32 %v1572_v39  ;;  %v1613_v16 = vadd.f32 %v1586_v5, %v1549_v48 }
 0x394   : > { %2187 = vlog2.f32 %v1573_v45  ;;  %v1614_v55 = vadd.f32 %v1588_v15, %v1550_v10 }
 0x395   : > { %2189 = vlog2.f32 %v1574_v49  ;;  %v1645_v4 = vsub.f32 %v1613_v16, %v1629_v2  ;;  %v1636_v49 = vld [vmem:[#allocation4 + $0x58] sm:$0xff]  ;;  %v1639_v5 = vld [vmem:[#allocation4 + $0x70] sm:$0xff] }
 0x396   : > { %2191 = vlog2.f32 %v1575_v17  ;;  %v1646_v31 = vsub.f32 %v1614_v55, %v1630_v21  ;;  %v1637_v17 = vld [vmem:[#allocation4 + $0x60] sm:$0xff] }
 0x397   : > { %2193 = vlog2.f32 %v1576_v44  ;;  %1661 = vst.msk [vmem:[%s2491_s20 + $0x20] sm:$0xff] %vm1263_vm1, %v1645_v4  ;;  %v1638_v44 = vld [vmem:[#allocation4 + $0x68] sm:$0xff] }
 0x398   : > { %v2176_v54 = vpop.eup %2175  ;;  %1662 = vst.msk [vmem:[%s2491_s20 + $0x28] sm:$0xff] %vm1263_vm1, %v1646_v31 }
 0x399   : > { %v2178_v61 = vpop.eup %2177  ;;  %v1590_v30 = vmul.f32 0.6931472, %v2176_v54 }
 0x39a   : > { %v2180_v29 = vpop.eup %2179  ;;  %v1592_v0 = vmul.f32 0.6931472, %v2178_v61 }
 0x39b   : > { %v2182_v8 = vpop.eup %2181  ;;  %v1615_v19 = vadd.f32 %v1590_v30, %v1551_v36  ;;  %v1594_v13 = vmul.f32 0.6931472, %v2180_v29 }
 0x39c   : > { %v2184_v60 = vpop.eup %2183  ;;  %v1616_v20 = vadd.f32 %v1592_v0, %v1552_v24  ;;  %v1596_v35 = vmul.f32 0.6931472, %v2182_v8 }
 0x39d   : > { %v2186_v62 = vpop.eup %2185  ;;  %v1647_v56 = vsub.f32 %v1615_v19, %v1631_v28  ;;  %v1617_v51 = vadd.f32 %v1594_v13, %v1553_v46  ;;  %v1598_v34 = vmul.f32 0.6931472, %v2184_v60 }
 0x39e   : > { %v2188_v39 = vpop.eup %2187  ;;  %v1648_v22 = vsub.f32 %v1616_v20, %v1632_v14  ;;  %v1618_v53 = vadd.f32 %v1596_v35, %v1554_v25  ;;  %v1600_v45 = vmul.f32 0.6931472, %v2186_v62 }
 0x39f   : > { %v2190_v37 = vpop.eup %2189  ;;  %1663 = vst.msk [vmem:[%s2491_s20 + $0x30] sm:$0xff] %vm1263_vm1, %v1647_v56  ;;  %v1649_v50 = vsub.f32 %v1617_v51, %v1633_v26  ;;  %v1619_v27 = vadd.f32 %v1598_v34, %v1555_v32  ;;  %v1602_v9 = vmul.f32 0.6931472, %v2188_v39 }
 0x3a0   : > { %v2192_v41 = vpop.eup %2191  ;;  %1664 = vst.msk [vmem:[%s2491_s20 + $0x38] sm:$0xff] %vm1263_vm1, %v1648_v22  ;;  %v1650_v58 = vsub.f32 %v1618_v53, %v1634_v40  ;;  %v1620_v6 = vadd.f32 %v1600_v45, %v1556_v18  ;;  %v1604_v3 = vmul.f32 0.6931472, %v2190_v37 }
 0x3a1   : > { %v2194_v33 = vpop.eup %2193  ;;  %1665 = vst.msk [vmem:[%s2491_s20 + $0x40] sm:$0xff] %vm1263_vm1, %v1649_v50  ;;  %v1651_v43 = vsub.f32 %v1619_v27, %v1635_v11  ;;  %v1621_v48 = vadd.f32 %v1602_v9, %v1557_v42  ;;  %v1606_v57 = vmul.f32 0.6931472, %v2192_v41 }
 0x3a2   : > { %1666 = vst.msk [vmem:[%s2491_s20 + $0x48] sm:$0xff] %vm1263_vm1, %v1650_v58  ;;  %v1652_v7 = vsub.f32 %v1620_v6, %v1636_v49  ;;  %v1622_v23 = vadd.f32 %v1604_v3, %v1558_v52  ;;  %v1608_v10 = vmul.f32 0.6931472, %v2194_v33 }
 0x3a3   : > { %1667 = vst.msk [vmem:[%s2491_s20 + $0x50] sm:$0xff] %vm1263_vm1, %v1651_v43  ;;  %v1653_v54 = vsub.f32 %v1621_v48, %v1637_v17  ;;  %v1623_v59 = vadd.f32 %v1606_v57, %v1559_v63 }
 0x3a4   : > { %1668 = vst.msk [vmem:[%s2491_s20 + $0x58] sm:$0xff] %vm1263_vm1, %v1652_v7  ;;  %v1654_v2 = vsub.f32 %v1622_v23, %v1638_v44  ;;  %v1624_v15 = vadd.f32 %v1608_v10, %v1560_v47 }
 0x3a5   : > { %1669 = vst.msk [vmem:[%s2491_s20 + $0x60] sm:$0xff] %vm1263_vm1, %v1653_v54  ;;  %v1655_v36 = vsub.f32 %v1623_v59, %v1639_v5 }
 0x3a6   : > { %1670 = vst.msk [vmem:[%s2491_s20 + $0x68] sm:$0xff] %vm1263_vm1, %v1654_v2  ;;  %v1656_v61 = vsub.f32 %v1624_v15, %v1640_v12 }
 0x3a7   : > { %1671 = vst.msk [vmem:[%s2491_s20 + $0x70] sm:$0xff] %vm1263_vm1, %v1655_v36 }
 0x3a8   : > { %1672 = vst.msk [vmem:[%s2491_s20 + $0x78] sm:$0xff] %vm1263_vm1, %v1656_v61 }
 0x3a9 PF: > { %s1923_s23 = sshll.u32 %s2293_s24, 7  ;;  %s1695_s30 = sshll.u32 %s2495_s16, 4  ;;  %s3264_s30 = int_to_ptr.vmem [resolvable:$true] %s1695_s30 }
 0x3aa   : > { %s1692_s26 = sadd.s32 %s1923_s23, %s2468_s8  ;;  %s3451_s20 = sand.u32 1, %s2273_s19  }
 0x3ab   : > { %s1903_s6 = sshll.u32 %s1692_s26, 6  ;;  %s3273_s17 = scalar_lea.sflag [#allocation7], %s3451_s20 }
 0x3ac   : > { %s3269_s13 = scalar_lea.hbm %s3335_s4, %s1903_s6  ;;  %s2195_s28 = scalar_lea.vmem %s3264_s30, 2048 }
 0x3ad   : > { %p2196_p7 = scmp.ne.s32.totalorder %s3264_s30, %s2195_s28  ;;  %s2310_s24 = smov [#allocation6]  }
 0x3ae   : > { %s2199_s16 = sshll.u32 %s2310_s24, 4  ;;  %s2200_s16 = int_to_ptr.vmem [resolvable:$false] %s2199_s16 }
 0x3af   : > { %p2197_p8 = pnand %p2196_p7, %p2423_p10  ;;  %s2201_s8 = scalar_lea.vmem %s2200_s16, 4096 }
 0x3b0   : > { %p2202_p11 = scmp.lt.s32.totalorder %s3264_s30, %s2200_s16  ;;  %p2203_p13 = scmp.lt.s32.totalorder %s2201_s8, %s2195_s28 }
 0x3b1   : > { %p2198_p9 = pneg %p2197_p8 }
 0x3b2   : > { %p2204_p0 = por %p2203_p13, %p2202_p11 }
 0x3b4   : > { %p2205_p1 = pnand %p2204_p0, %p2198_p9 }
 0x3b6   : > { %2208 = shalt.err (!%p2205_p1)
}
 0x3b7   : > { %s2209_s12 = scalar_lea.hbm %s3269_s13, 2048  ;;  %s2213_s21 = scalar_lea.hbm %s3335_s4, 16384 }
 0x3b8   : > { %p2210_p2 = scmp.ne.s32.totalorder %s3269_s13, %s2209_s12  ;;  %p2214_p5 = scmp.lt.u32.totalorder %s3269_s13, %s3335_s4 }
 0x3b9   : > { %p2215_p6 = scmp.lt.u32.totalorder %s2213_s21, %s2209_s12  ;;  %p2217_p8 = scmp.lt.u32.totalorder %s2209_s12, %s3269_s13 }
 0x3ba   : > { %p2211_p3 = pnand %p2210_p2, %p2423_p10 }
 0x3bb   : > { %p2216_p7 = por %p2215_p6, %p2214_p5 }
 0x3bc   : > { %p2212_p4 = pneg %p2211_p3 }
 0x3bd   : > { %p2218_p9 = por %p2217_p8, %p2216_p7 }
 0x3bf   : > { %p2219_p11 = pnand %p2218_p9, %p2212_p4 }
 0x3c1   : > { %2222 = shalt.err (!%p2219_p11)
}
 0x3c2   : > { %s2311_s1 = smov 128   ;;  %s2312_s22 = smov 512  }
 0x3c3   : > { %s2313_s25 = smov 8  }
 0x3c4   : > { %1940 = dma.vmem_to_hbm [thread:$0]  (%p2423_p10), %s3264_s30, 2048, %s3269_s13, %s3273_s17, %s2311_s1, %s2312_s22, %s2313_s25  }
 0x3c5 PF: > { %p1946_p13 = scmp.ge.s32.totalorder %s2305_s27, 2  ;;  %s1714_s26 = sand.u32 1, %s2269_s18  }
 0x3c6   : > { %s1715_s6 = scalar_lea.sflag [#allocation7], %s1714_s26 }
 0x3c7   : > { %p1943_p0 = pnand %p1946_p13, %p2430_p12 }
 0x3c9   : > { %2264 = dma.done.wait (!%p1943_p0), %s1715_s6, 2048  }
 0x3ca   : > { %2266 = vsyncadd (!%p1943_p0), %s1715_s6, 4294965248  ;;  %s19_s27 = sadd.s32 1, %s2305_s27   ;;  %s3453_s11 = sld [smem:[#allocation9_spill]] }
 0x3cb   : > { %p16_p1 = scmp.ge.s32.totalorder %s19_s27, 10   ;;  %s3454_s20 = sld [smem:[#allocation16_spill]] }
 0x3cc   : > { %s3455_s21 = sld [smem:[#allocation10_spill]]  ;;  %s3456_s22 = sld [smem:[#allocation15_spill]] }
 0x3cd   : > { %s3457_s23 = sld [smem:[#allocation11_spill]]  ;;  %s3458_s24 = sld [smem:[#allocation12_spill]] }
 0x3ce   : > { %s3459_s25 = sld [smem:[#allocation13_spill]]  ;;  %s3460_s26 = sld [smem:[#allocation14_spill]] }
 0x3cf   : > { %s3461_s18 = smov %s2273_s19  ;;  %18 = sbr.rel (!%p16_p1) target bundleno = 8 (0x8), region = 143 }
 0x3d0   : > { %s3462_s19 = smov %s3453_s11 }
 0x3d6   :  { %1728 = vsyncpa [#allocation7], 1 }
 0x3d7   :  { %1730 = vsyncpa [#allocation7 + $0x1], 1 }

</bundles_post_ra>
